<compile_context>
chip_gen: v7x
topology: tpu7x:2x2x1
jax: 0.10.0
libtpu: 0.0.40
codegen_flags: <defaults>
</compile_context>

<pallas_src>
import functools
import math

import jax
import jax.numpy as jnp
from jax import lax
from jax.experimental import pallas as pl
from jax.experimental.pallas import tpu as pltpu

NEG_INF = -1e30


def _ln_f32(x, g, b, eps=1e-5):
    """LayerNorm over the last axis, all math in f32."""
    x = x.astype(jnp.float32)
    mu = jnp.mean(x, axis=-1, keepdims=True)
    var = jnp.mean(jnp.square(x - mu), axis=-1, keepdims=True)
    return (x - mu) * lax.rsqrt(var + eps) * g + b


# ------------------ fused transformer stack (one pallas_call) ----------------

def _transformer_kernel(x_ref,
                        ln1g_ref, ln1b_ref, wqkv_ref, bqkv_ref,
                        wout_ref, bout_ref,
                        ln2g_ref, ln2b_ref, wfc_ref, bfc_ref,
                        wproj_ref, bproj_ref,
                        o_ref,
                        x_scr, attn_scr,
                        *, n_batch, seq_len, n_heads, d_model):
    layer = pl.program_id(1)
    dh = d_model // n_heads
    scale = 1.0 / math.sqrt(dh)

    # Load this batch-group's residual stream into VMEM scratch once.
    @pl.when(layer == 0)
    def _():
        x_scr[...] = x_ref[...].astype(jnp.float32)

    x = x_scr[...]                                            # (rows, D) f32

    # Additive causal mask built in-registers (no HBM input), kept in f32.
    r = lax.broadcasted_iota(jnp.int32, (seq_len, seq_len), 0)
    c = lax.broadcasted_iota(jnp.int32, (seq_len, seq_len), 1)
    causal = jnp.where(c > r, NEG_INF, 0.0).astype(jnp.float32)

    # ---------------- multi-head self-attention ----------------
    h = _ln_f32(x, ln1g_ref[0], ln1b_ref[0])
    qkv = jnp.dot(h.astype(jnp.bfloat16), wqkv_ref[0],
                  preferred_element_type=jnp.float32) + bqkv_ref[0]   # (rows, 3D)

    for hd in range(n_heads):
        c0 = hd * dh
        q_h = qkv[:, c0:c0 + dh]
        k_h = qkv[:, d_model + c0:d_model + c0 + dh]
        v_h = qkv[:, 2 * d_model + c0:2 * d_model + c0 + dh]
        for n in range(n_batch):
            r0 = n * seq_len
            q = q_h[r0:r0 + seq_len].astype(jnp.bfloat16)
            k = k_h[r0:r0 + seq_len].astype(jnp.bfloat16)
            v = v_h[r0:r0 + seq_len].astype(jnp.bfloat16)
            # q @ k^T without materializing the transpose.
            s = lax.dot_general(q, k, (((1,), (1,)), ((), ())),
                                preferred_element_type=jnp.float32)
            s = s * scale + causal
            s = s - jnp.max(s, axis=-1, keepdims=True)
            p = jnp.exp(s)
            p = p * pl.reciprocal(jnp.sum(p, axis=-1, keepdims=True), approx=True)
            attn_scr[r0:r0 + seq_len, c0:c0 + dh] = jnp.dot(
                p.astype(jnp.bfloat16), v, preferred_element_type=jnp.float32)

    attn = attn_scr[...]
    x = x + jnp.dot(attn.astype(jnp.bfloat16), wout_ref[0],
                    preferred_element_type=jnp.float32) + bout_ref[0]

    # ---------------- MLP (QuickGELU) ----------------
    h2 = _ln_f32(x, ln2g_ref[0], ln2b_ref[0])
    h2 = jnp.dot(h2.astype(jnp.bfloat16), wfc_ref[0],
                 preferred_element_type=jnp.float32) + bfc_ref[0]
    h2 = h2 * jax.nn.sigmoid(1.702 * h2)                      # QuickGELU, f32
    x = x + jnp.dot(h2.astype(jnp.bfloat16), wproj_ref[0],
                    preferred_element_type=jnp.float32) + bproj_ref[0]

    x_scr[...] = x

    @pl.when(layer == pl.num_programs(1) - 1)
    def _():
        o_ref[...] = x.astype(o_ref.dtype)


def transformer_stack(x2d, p, *, seq_len, n_heads):
    """Run the whole CLIP text transformer in a single pallas_call.

    x2d: (N*L, D) batch-major rows (mathematically identical to the PyTorch
    (L, N, D) sequence-major convention, since attention is per batch element).
    """
    rows_total, d_model = x2d.shape
    n_batch = rows_total // seq_len
    n_layers = p["w_qkv"].shape[0]
    # >= 2 parallel grid steps (v7x dual TensorCore / megacore) when possible.
    groups = 2 if (n_batch % 2 == 0 and n_batch >= 2) else 1
    npg = n_batch // groups
    rows = npg * seq_len

    w3 = lambda g, l: (l, 0, 0)     # stacked per-layer weights / biases
    xmap = lambda g, l: (g, 0)      # batch-group block of the residual stream

    kernel = functools.partial(_transformer_kernel, n_batch=npg,
                               seq_len=seq_len, n_heads=n_heads,
                               d_model=d_model)

    return pl.pallas_call(
        kernel,
        out_shape=jax.ShapeDtypeStruct((rows_total, d_model), jnp.float32),
        grid=(groups, n_layers),
        in_specs=[
            pl.BlockSpec((rows, d_model), xmap),               # x
            pl.BlockSpec((1, 1, d_model), w3),                 # ln1_g
            pl.BlockSpec((1, 1, d_model), w3),                 # ln1_b
            pl.BlockSpec((1, d_model, 3 * d_model), w3),       # w_qkv (bf16)
            pl.BlockSpec((1, 1, 3 * d_model), w3),             # b_qkv
            pl.BlockSpec((1, d_model, d_model), w3),           # w_out (bf16)
            pl.BlockSpec((1, 1, d_model), w3),                 # b_out
            pl.BlockSpec((1, 1, d_model), w3),                 # ln2_g
            pl.BlockSpec((1, 1, d_model), w3),                 # ln2_b
            pl.BlockSpec((1, d_model, 4 * d_model), w3),       # w_fc (bf16)
            pl.BlockSpec((1, 1, 4 * d_model), w3),             # b_fc
            pl.BlockSpec((1, 4 * d_model, d_model), w3),       # w_proj (bf16)
            pl.BlockSpec((1, 1, d_model), w3),                 # b_proj
        ],
        out_specs=pl.BlockSpec((rows, d_model), xmap),
        scratch_shapes=[pltpu.VMEM((rows, d_model), jnp.float32),   # residual
                        pltpu.VMEM((rows, d_model), jnp.float32)],  # attn out
        compiler_params=pltpu.CompilerParams(
            dimension_semantics=("parallel", "arbitrary")),
    )(x2d,
      p["ln1_g"], p["ln1_b"], p["w_qkv"], p["b_qkv"],
      p["w_out"], p["b_out"],
      p["ln2_g"], p["ln2_b"], p["w_fc"], p["b_fc"],
      p["w_proj"], p["b_proj"])


# ------------- fused epilogue: ln_final + text_projection (+ EOT) ------------

def _head_seq_kernel(x_ref, g_ref, b_ref, w_ref, o_ref):
    y = _ln_f32(x_ref[0], g_ref[...], b_ref[...])              # (L, D)
    o_ref[0] = jnp.dot(y.astype(jnp.bfloat16), w_ref[...],
                       preferred_element_type=jnp.float32).astype(o_ref.dtype)


def head_sequence(x, g, b, w):
    """if_sequence=True branch: ln_final(x) @ text_projection, per token."""
    N, L, D = x.shape
    E = w.shape[1]
    return pl.pallas_call(
        _head_seq_kernel,
        out_shape=jax.ShapeDtypeStruct((N, L, E), jnp.float32),
        grid=(N,),
        in_specs=[pl.BlockSpec((1, L, D), lambda i: (i, 0, 0)),
                  pl.BlockSpec((1, D), lambda i: (0, 0)),
                  pl.BlockSpec((1, D), lambda i: (0, 0)),
                  pl.BlockSpec((D, E), lambda i: (0, 0))],
        out_specs=pl.BlockSpec((1, L, E), lambda i: (i, 0, 0)),
        compiler_params=pltpu.CompilerParams(dimension_semantics=("parallel",)),
    )(x, g.reshape(1, D), b.reshape(1, D), w)


def _head_eot_kernel(eot_ref, x_ref, g_ref, b_ref, w_ref, o_ref):
    i = pl.program_id(0)
    row = x_ref[0, pl.ds(eot_ref[i], 1), :]                    # (1, D) EOT token
    y = _ln_f32(row, g_ref[...], b_ref[...])
    o_ref[0] = jnp.dot(y.astype(jnp.bfloat16), w_ref[...],
                       preferred_element_type=jnp.float32).astype(o_ref.dtype)


def head_eot(x, eot, g, b, w):
    """if_sequence=False branch: gather EOT token, ln_final, project."""
    N, L, D = x.shape
    E = w.shape[1]
    grid_spec = pltpu.PrefetchScalarGridSpec(
        num_scalar_prefetch=1,                                  # eot indices
        grid=(N,),
        in_specs=[pl.BlockSpec((1, L, D), lambda i, eot: (i, 0, 0)),
                  pl.BlockSpec((1, D), lambda i, eot: (0, 0)),
                  pl.BlockSpec((1, D), lambda i, eot: (0, 0)),
                  pl.BlockSpec((D, E), lambda i, eot: (0, 0))],
        out_specs=pl.BlockSpec((1, 1, E), lambda i, eot: (i, 0, 0)),
    )
    out = pl.pallas_call(
        _head_eot_kernel,
        out_shape=jax.ShapeDtypeStruct((N, 1, E), jnp.float32),
        grid_spec=grid_spec,
        compiler_params=pltpu.CompilerParams(dimension_semantics=("parallel",)),
    )(eot, x, g.reshape(1, D), b.reshape(1, D), w)
    return out[:, 0, :]


# ------------------------------ TextEncoder ----------------------------------

def text_encoder_forward(params, prompts, tokenized_prompts, *,
                         if_embedding=True, if_sequence=False):
    """Pallas equivalent of TextEncoder.forward."""
    if not if_embedding:
        tokenized_prompts = prompts
        prompts = jnp.take(params["token_emb"], prompts, axis=0)    # (N, L, D)
    N, L, D = prompts.shape
    x = prompts.astype(jnp.float32) + params["pos_emb"][None]
    # PyTorch permutes to (L, N, D) for nn.MultiheadAttention; the fused kernel
    # works batch-major (N*L, D) — mathematically identical.
    x = transformer_stack(x.reshape(N * L, D), params,
                          seq_len=L, n_heads=params["n_heads"])
    x = x.reshape(N, L, D)
    if if_sequence:
        return head_sequence(x, params["lnf_g"], params["lnf_b"],
                             params["text_proj"])                   # (N, L, E)
    eot = jnp.argmax(tokenized_prompts, axis=-1).astype(jnp.int32)  # (N,)
    return head_eot(x, eot, params["lnf_g"], params["lnf_b"],
                    params["text_proj"])                            # (N, E)


# ------------------------------ parameter init --------------------------------

def init_params(key, *, vocab, L, D, E, n_heads, n_layers):
    ks = iter(jax.random.split(key, 16))

    def nrm(shape, std):
        return std * jax.random.normal(next(ks), shape, jnp.float32)

    p = {"n_heads": n_heads}
    p["token_emb"] = nrm((vocab, D), 0.02)
    p["pos_emb"] = nrm((L, D), 0.01)
    # Per-layer weights stacked on a leading layer axis; MXU operands in bf16.
    p["ln1_g"] = jnp.ones((n_layers, 1, D), jnp.float32)
    p["ln1_b"] = jnp.zeros((n_layers, 1, D), jnp.float32)
    p["w_qkv"] = nrm((n_layers, D, 3 * D), D ** -0.5).astype(jnp.bfloat16)
    p["b_qkv"] = jnp.zeros((n_layers, 1, 3 * D), jnp.float32)
    p["w_out"] = nrm((n_layers, D, D), D ** -0.5).astype(jnp.bfloat16)
    p["b_out"] = jnp.zeros((n_layers, 1, D), jnp.float32)
    p["ln2_g"] = jnp.ones((n_layers, 1, D), jnp.float32)
    p["ln2_b"] = jnp.zeros((n_layers, 1, D), jnp.float32)
    p["w_fc"] = nrm((n_layers, D, 4 * D), D ** -0.5).astype(jnp.bfloat16)
    p["b_fc"] = jnp.zeros((n_layers, 1, 4 * D), jnp.float32)
    p["w_proj"] = nrm((n_layers, 4 * D, D), (4 * D) ** -0.5).astype(jnp.bfloat16)
    p["b_proj"] = jnp.zeros((n_layers, 1, D), jnp.float32)
    p["lnf_g"] = jnp.ones((D,), jnp.float32)
    p["lnf_b"] = jnp.zeros((D,), jnp.float32)
    p["text_proj"] = nrm((D, E), D ** -0.5).astype(jnp.bfloat16)
    return p


# ---------------------------------- main --------------------------------------

if __name__ == "__main__":
    L, D, E = 8, 128, 128            # lane-dense feature dims (multiples of 128)
    n_heads, n_layers = 4, 2
    vocab = 64
    n_cls = 4

    key = jax.random.PRNGKey(0)
    params = init_params(key, vocab=vocab, L=L, D=D, E=E,
                         n_heads=n_heads, n_layers=n_layers)

    # (1) caption path: token ids, if_embedding=False, if_sequence=True
    captions = jnp.asarray([[1, 5, 7, vocab - 1, 0, 0, 0, 0],
                            [1, 9, 12, 4, 6, vocab - 1, 0, 0]], jnp.int32)
    seq_feats = text_encoder_forward(params, captions, None,
                                     if_embedding=False, if_sequence=True)

    # (2) prompt path: precomputed prompt embeddings, EOT-pooled features
    tok_rows = [[1, 2, 2, 5 + i, vocab - 1] + [0] * (L - 5) for i in range(n_cls)]
    tokenized = jnp.asarray(tok_rows, jnp.int32)
    prompt_emb = jnp.take(params["token_emb"], tokenized, axis=0)   # (C, L, D)
    cls_feats = text_encoder_forward(params, prompt_emb, tokenized,
                                     if_embedding=True, if_sequence=False)

    jax.block_until_ready(seq_feats)
    jax.block_until_ready(cls_feats)

    assert seq_feats.shape == (2, L, E)
    assert cls_feats.shape == (n_cls, E)
    assert bool(jnp.all(jnp.isfinite(seq_feats)))
    assert bool(jnp.all(jnp.isfinite(cls_feats)))
    print("KERNEL_OK")
</pallas_src>

<mosaic_0001>
module attributes {stable_mosaic.version = 11 : i64} {
  func.func @_transformer_kernel(%arg0: i32, %arg1: i32, %arg2: memref<8x128xf32, #tpu.memory_space<vmem>>, %arg3: memref<1x1x128xf32, #tpu.memory_space<vmem>>, %arg4: memref<1x1x128xf32, #tpu.memory_space<vmem>>, %arg5: memref<1x128x384xbf16, #tpu.memory_space<vmem>>, %arg6: memref<1x1x384xf32, #tpu.memory_space<vmem>>, %arg7: memref<1x128x128xbf16, #tpu.memory_space<vmem>>, %arg8: memref<1x1x128xf32, #tpu.memory_space<vmem>>, %arg9: memref<1x1x128xf32, #tpu.memory_space<vmem>>, %arg10: memref<1x1x128xf32, #tpu.memory_space<vmem>>, %arg11: memref<1x128x512xbf16, #tpu.memory_space<vmem>>, %arg12: memref<1x1x512xf32, #tpu.memory_space<vmem>>, %arg13: memref<1x512x128xbf16, #tpu.memory_space<vmem>>, %arg14: memref<1x1x128xf32, #tpu.memory_space<vmem>>, %arg15: memref<8x128xf32, #tpu.memory_space<vmem>>, %arg16: memref<8x128xf32, #tpu.memory_space<vmem>>, %arg17: memref<8x128xf32, #tpu.memory_space<vmem>>) attributes {dimension_semantics = [#tpu.dimension_semantics<parallel>, #tpu.dimension_semantics<arbitrary>], iteration_bounds = array<i64: 2, 2>, scalar_prefetch = 0 : i64, scratch_operands = 2 : i64, tpu.core_type = #tpu.core_type<tc>, window_params = [{transform_indices = @transform_0, window_bounds = array<i64: 8, 128>}, {transform_indices = @transform_1, window_bounds = array<i64: 1, 1, 128>}, {transform_indices = @transform_2, window_bounds = array<i64: 1, 1, 128>}, {transform_indices = @transform_3, window_bounds = array<i64: 1, 128, 384>}, {transform_indices = @transform_4, window_bounds = array<i64: 1, 1, 384>}, {transform_indices = @transform_5, window_bounds = array<i64: 1, 128, 128>}, {transform_indices = @transform_6, window_bounds = array<i64: 1, 1, 128>}, {transform_indices = @transform_7, window_bounds = array<i64: 1, 1, 128>}, {transform_indices = @transform_8, window_bounds = array<i64: 1, 1, 128>}, {transform_indices = @transform_9, window_bounds = array<i64: 1, 128, 512>}, {transform_indices = @transform_10, window_bounds = array<i64: 1, 1, 512>}, {transform_indices = @transform_11, window_bounds = array<i64: 1, 512, 128>}, {transform_indices = @transform_12, window_bounds = array<i64: 1, 1, 128>}, {transform_indices = @transform_13, window_bounds = array<i64: 8, 128>}]} {
    %c0_i32 = arith.constant 0 : i32
    %0 = arith.cmpi eq, %arg1, %c0_i32 : i32
    %1 = arith.extui %0 : i1 to i32
    %c0_i32_0 = arith.constant 0 : i32
    %2 = arith.cmpi ne, %1, %c0_i32_0 : i32
    scf.if %2 {
      %c0_85 = arith.constant 0 : index
      %c0_86 = arith.constant 0 : index
      %201 = vector.load %arg2[%c0_85, %c0_86] : memref<8x128xf32, #tpu.memory_space<vmem>>, vector<8x128xf32>
      %c0_87 = arith.constant 0 : index
      %c0_88 = arith.constant 0 : index
      %202 = vector.load %arg16[%c0_87, %c0_88] : memref<8x128xf32, #tpu.memory_space<vmem>>, vector<8x128xf32>
      tpu.vector_store %arg16[%c0_87, %c0_88], %201 {strides = array<i32>} : memref<8x128xf32, #tpu.memory_space<vmem>>, vector<8x128xf32>,
    } else {
    }
    %c0 = arith.constant 0 : index
    %c0_1 = arith.constant 0 : index
    %3 = vector.load %arg16[%c0, %c0_1] : memref<8x128xf32, #tpu.memory_space<vmem>>, vector<8x128xf32>
    %4 = tpu.iota {dimensions = array<i32: 0>} : vector<8x8xi32>
    %5 = tpu.iota {dimensions = array<i32: 1>} : vector<8x8xi32>
    %6 = arith.cmpi sgt, %5, %4 : vector<8x8xi32>
    %cst = arith.constant -1.000000e+30 : f32
    %cst_2 = arith.constant 0.000000e+00 : f32
    %7 = vector.broadcast %cst : f32 to vector<8x8xf32>
    %8 = vector.broadcast %cst_2 : f32 to vector<8x8xf32>
    %9 = arith.select %6, %7, %8 : vector<8x8xi1>, vector<8x8xf32>
    %c0_3 = arith.constant 0 : index
    %c0_4 = arith.constant 0 : index
    %c0_5 = arith.constant 0 : index
    %10 = vector.load %arg3[%c0_3, %c0_4, %c0_5] : memref<1x1x128xf32, #tpu.memory_space<vmem>>, vector<1x1x128xf32>
    %11 = vector.shape_cast %10 : vector<1x1x128xf32> to vector<1x128xf32>
    %c0_6 = arith.constant 0 : index
    %c0_7 = arith.constant 0 : index
    %c0_8 = arith.constant 0 : index
    %12 = vector.load %arg4[%c0_6, %c0_7, %c0_8] : memref<1x1x128xf32, #tpu.memory_space<vmem>>, vector<1x1x128xf32>
    %13 = vector.shape_cast %12 : vector<1x1x128xf32> to vector<1x128xf32>
    %cst_9 = arith.constant dense<0.000000e+00> : vector<8xf32>
    %14 = vector.multi_reduction <add>, %3, %cst_9 [1] : vector<8x128xf32> to vector<8xf32>
    %15 = vector.shape_cast %14 : vector<8xf32> to vector<8x1xf32>
    %cst_10 = arith.constant 1.280000e+02 : f32
    %16 = vector.broadcast %cst_10 : f32 to vector<8x1xf32>
    %17 = arith.divf %15, %16 : vector<8x1xf32>
    %18 = vector.broadcast %17 : vector<8x1xf32> to vector<8x128xf32>
    %19 = arith.subf %3, %18 : vector<8x128xf32>
    %20 = arith.mulf %19, %19 : vector<8x128xf32>
    %cst_11 = arith.constant dense<0.000000e+00> : vector<8xf32>
    %21 = vector.multi_reduction <add>, %20, %cst_11 [1] : vector<8x128xf32> to vector<8xf32>
    %22 = vector.shape_cast %21 : vector<8xf32> to vector<8x1xf32>
    %cst_12 = arith.constant 1.280000e+02 : f32
    %23 = vector.broadcast %cst_12 : f32 to vector<8x1xf32>
    %24 = arith.divf %22, %23 : vector<8x1xf32>
    %25 = vector.broadcast %17 : vector<8x1xf32> to vector<8x128xf32>
    %26 = arith.subf %3, %25 : vector<8x128xf32>
    %cst_13 = arith.constant 9.99999974E-6 : f32
    %27 = vector.broadcast %cst_13 : f32 to vector<8x1xf32>
    %28 = arith.addf %24, %27 : vector<8x1xf32>
    %29 = math.rsqrt %28 : vector<8x1xf32>
    %30 = vector.broadcast %29 : vector<8x1xf32> to vector<8x128xf32>
    %31 = arith.mulf %26, %30 : vector<8x128xf32>
    %32 = vector.broadcast %11 : vector<1x128xf32> to vector<8x128xf32>
    %33 = arith.mulf %31, %32 : vector<8x128xf32>
    %34 = vector.broadcast %13 : vector<1x128xf32> to vector<8x128xf32>
    %35 = arith.addf %33, %34 : vector<8x128xf32>
    %36 = arith.truncf %35 : vector<8x128xf32> to vector<8x128xbf16>
    %c0_14 = arith.constant 0 : index
    %c0_15 = arith.constant 0 : index
    %c0_16 = arith.constant 0 : index
    %37 = vector.load %arg5[%c0_14, %c0_15, %c0_16] : memref<1x128x384xbf16, #tpu.memory_space<vmem>>, vector<1x128x384xbf16>
    %38 = vector.shape_cast %37 : vector<1x128x384xbf16> to vector<128x384xbf16>
    %cst_17 = arith.constant dense<0.000000e+00> : vector<8x384xf32>
    %39 = tpu.matmul %36, %38, %cst_17 {dimension_numbers = #tpu.dot_dimension_numbers<[1], [0], [0], [1], [0, 0, 1, 1], [], []>} : vector<8x128xbf16>, vector<128x384xbf16>, vector<8x384xf32> -> vector<8x384xf32>
    %c0_18 = arith.constant 0 : index
    %c0_19 = arith.constant 0 : index
    %c0_20 = arith.constant 0 : index
    %40 = vector.load %arg6[%c0_18, %c0_19, %c0_20] : memref<1x1x384xf32, #tpu.memory_space<vmem>>, vector<1x1x384xf32>
    %41 = vector.shape_cast %40 : vector<1x1x384xf32> to vector<1x384xf32>
    %42 = vector.broadcast %41 : vector<1x384xf32> to vector<8x384xf32>
    %43 = arith.addf %39, %42 : vector<8x384xf32>
    %44 = vector.extract_strided_slice %43 {offsets = [0, 0], sizes = [8, 32], strides = [1, 1]} : vector<8x384xf32> to vector<8x32xf32>
    %45 = vector.extract_strided_slice %43 {offsets = [0, 128], sizes = [8, 32], strides = [1, 1]} : vector<8x384xf32> to vector<8x32xf32>
    %46 = vector.extract_strided_slice %43 {offsets = [0, 256], sizes = [8, 32], strides = [1, 1]} : vector<8x384xf32> to vector<8x32xf32>
    %47 = arith.truncf %44 : vector<8x32xf32> to vector<8x32xbf16>
    %48 = arith.truncf %45 : vector<8x32xf32> to vector<8x32xbf16>
    %49 = arith.truncf %46 : vector<8x32xf32> to vector<8x32xbf16>
    %cst_21 = arith.constant dense<0.000000e+00> : vector<8x8xf32>
    %50 = tpu.matmul %47, %48, %cst_21 {dimension_numbers = #tpu.dot_dimension_numbers<[1], [1], [0], [0], [0, 0, 1, 0], [], []>} : vector<8x32xbf16>, vector<8x32xbf16>, vector<8x8xf32> -> vector<8x8xf32>
    %cst_22 = arith.constant 0.176776692 : f32
    %51 = vector.broadcast %cst_22 : f32 to vector<8x8xf32>
    %52 = arith.mulf %50, %51 : vector<8x8xf32>
    %53 = arith.addf %52, %9 : vector<8x8xf32>
    %cst_23 = arith.constant dense<0xFF800000> : vector<8xf32>
    %54 = vector.multi_reduction <maximumf>, %53, %cst_23 [1] : vector<8x8xf32> to vector<8xf32>
    %55 = vector.shape_cast %54 : vector<8xf32> to vector<8x1xf32>
    %56 = vector.broadcast %55 : vector<8x1xf32> to vector<8x8xf32>
    %57 = arith.subf %53, %56 : vector<8x8xf32>
    %58 = math.exp %57 : vector<8x8xf32>
    %cst_24 = arith.constant dense<0.000000e+00> : vector<8xf32>
    %59 = vector.multi_reduction <add>, %58, %cst_24 [1] : vector<8x8xf32> to vector<8xf32>
    %60 = vector.shape_cast %59 : vector<8xf32> to vector<8x1xf32>
    %61 = tpu.reciprocal %60 {approx = true} : vector<8x1xf32> -> vector<8x1xf32>
    %62 = vector.broadcast %61 : vector<8x1xf32> to vector<8x8xf32>
    %63 = arith.mulf %58, %62 : vector<8x8xf32>
    %64 = arith.truncf %63 : vector<8x8xf32> to vector<8x8xbf16>
    %cst_25 = arith.constant dense<0.000000e+00> : vector<8x32xf32>
    %65 = tpu.matmul %64, %49, %cst_25 {dimension_numbers = #tpu.dot_dimension_numbers<[1], [0], [0], [1], [0, 0, 1, 1], [], []>} : vector<8x8xbf16>, vector<8x32xbf16>, vector<8x32xf32> -> vector<8x32xf32>
    %c0_26 = arith.constant 0 : index
    %c0_27 = arith.constant 0 : index
    %66 = vector.load %arg17[%c0_26, %c0_27] : memref<8x128xf32, #tpu.memory_space<vmem>>, vector<8x32xf32>
    tpu.vector_store %arg17[%c0_26, %c0_27], %65 {strides = array<i32>} : memref<8x128xf32, #tpu.memory_space<vmem>>, vector<8x32xf32>,
    %67 = vector.extract_strided_slice %43 {offsets = [0, 32], sizes = [8, 32], strides = [1, 1]} : vector<8x384xf32> to vector<8x32xf32>
    %68 = vector.extract_strided_slice %43 {offsets = [0, 160], sizes = [8, 32], strides = [1, 1]} : vector<8x384xf32> to vector<8x32xf32>
    %69 = vector.extract_strided_slice %43 {offsets = [0, 288], sizes = [8, 32], strides = [1, 1]} : vector<8x384xf32> to vector<8x32xf32>
    %70 = arith.truncf %67 : vector<8x32xf32> to vector<8x32xbf16>
    %71 = arith.truncf %68 : vector<8x32xf32> to vector<8x32xbf16>
    %72 = arith.truncf %69 : vector<8x32xf32> to vector<8x32xbf16>
    %cst_28 = arith.constant dense<0.000000e+00> : vector<8x8xf32>
    %73 = tpu.matmul %70, %71, %cst_28 {dimension_numbers = #tpu.dot_dimension_numbers<[1], [1], [0], [0], [0, 0, 1, 0], [], []>} : vector<8x32xbf16>, vector<8x32xbf16>, vector<8x8xf32> -> vector<8x8xf32>
    %cst_29 = arith.constant 0.176776692 : f32
    %74 = vector.broadcast %cst_29 : f32 to vector<8x8xf32>
    %75 = arith.mulf %73, %74 : vector<8x8xf32>
    %76 = arith.addf %75, %9 : vector<8x8xf32>
    %cst_30 = arith.constant dense<0xFF800000> : vector<8xf32>
    %77 = vector.multi_reduction <maximumf>, %76, %cst_30 [1] : vector<8x8xf32> to vector<8xf32>
    %78 = vector.shape_cast %77 : vector<8xf32> to vector<8x1xf32>
    %79 = vector.broadcast %78 : vector<8x1xf32> to vector<8x8xf32>
    %80 = arith.subf %76, %79 : vector<8x8xf32>
    %81 = math.exp %80 : vector<8x8xf32>
    %cst_31 = arith.constant dense<0.000000e+00> : vector<8xf32>
    %82 = vector.multi_reduction <add>, %81, %cst_31 [1] : vector<8x8xf32> to vector<8xf32>
    %83 = vector.shape_cast %82 : vector<8xf32> to vector<8x1xf32>
    %84 = tpu.reciprocal %83 {approx = true} : vector<8x1xf32> -> vector<8x1xf32>
    %85 = vector.broadcast %84 : vector<8x1xf32> to vector<8x8xf32>
    %86 = arith.mulf %81, %85 : vector<8x8xf32>
    %87 = arith.truncf %86 : vector<8x8xf32> to vector<8x8xbf16>
    %cst_32 = arith.constant dense<0.000000e+00> : vector<8x32xf32>
    %88 = tpu.matmul %87, %72, %cst_32 {dimension_numbers = #tpu.dot_dimension_numbers<[1], [0], [0], [1], [0, 0, 1, 1], [], []>} : vector<8x8xbf16>, vector<8x32xbf16>, vector<8x32xf32> -> vector<8x32xf32>
    %c0_33 = arith.constant 0 : index
    %c32 = arith.constant 32 : index
    %89 = vector.load %arg17[%c0_33, %c32] : memref<8x128xf32, #tpu.memory_space<vmem>>, vector<8x32xf32>
    tpu.vector_store %arg17[%c0_33, %c32], %88 {strides = array<i32>} : memref<8x128xf32, #tpu.memory_space<vmem>>, vector<8x32xf32>,
    %90 = vector.extract_strided_slice %43 {offsets = [0, 64], sizes = [8, 32], strides = [1, 1]} : vector<8x384xf32> to vector<8x32xf32>
    %91 = vector.extract_strided_slice %43 {offsets = [0, 192], sizes = [8, 32], strides = [1, 1]} : vector<8x384xf32> to vector<8x32xf32>
    %92 = vector.extract_strided_slice %43 {offsets = [0, 320], sizes = [8, 32], strides = [1, 1]} : vector<8x384xf32> to vector<8x32xf32>
    %93 = arith.truncf %90 : vector<8x32xf32> to vector<8x32xbf16>
    %94 = arith.truncf %91 : vector<8x32xf32> to vector<8x32xbf16>
    %95 = arith.truncf %92 : vector<8x32xf32> to vector<8x32xbf16>
    %cst_34 = arith.constant dense<0.000000e+00> : vector<8x8xf32>
    %96 = tpu.matmul %93, %94, %cst_34 {dimension_numbers = #tpu.dot_dimension_numbers<[1], [1], [0], [0], [0, 0, 1, 0], [], []>} : vector<8x32xbf16>, vector<8x32xbf16>, vector<8x8xf32> -> vector<8x8xf32>
    %cst_35 = arith.constant 0.176776692 : f32
    %97 = vector.broadcast %cst_35 : f32 to vector<8x8xf32>
    %98 = arith.mulf %96, %97 : vector<8x8xf32>
    %99 = arith.addf %98, %9 : vector<8x8xf32>
    %cst_36 = arith.constant dense<0xFF800000> : vector<8xf32>
    %100 = vector.multi_reduction <maximumf>, %99, %cst_36 [1] : vector<8x8xf32> to vector<8xf32>
    %101 = vector.shape_cast %100 : vector<8xf32> to vector<8x1xf32>
    %102 = vector.broadcast %101 : vector<8x1xf32> to vector<8x8xf32>
    %103 = arith.subf %99, %102 : vector<8x8xf32>
    %104 = math.exp %103 : vector<8x8xf32>
    %cst_37 = arith.constant dense<0.000000e+00> : vector<8xf32>
    %105 = vector.multi_reduction <add>, %104, %cst_37 [1] : vector<8x8xf32> to vector<8xf32>
    %106 = vector.shape_cast %105 : vector<8xf32> to vector<8x1xf32>
    %107 = tpu.reciprocal %106 {approx = true} : vector<8x1xf32> -> vector<8x1xf32>
    %108 = vector.broadcast %107 : vector<8x1xf32> to vector<8x8xf32>
    %109 = arith.mulf %104, %108 : vector<8x8xf32>
    %110 = arith.truncf %109 : vector<8x8xf32> to vector<8x8xbf16>
    %cst_38 = arith.constant dense<0.000000e+00> : vector<8x32xf32>
    %111 = tpu.matmul %110, %95, %cst_38 {dimension_numbers = #tpu.dot_dimension_numbers<[1], [0], [0], [1], [0, 0, 1, 1], [], []>} : vector<8x8xbf16>, vector<8x32xbf16>, vector<8x32xf32> -> vector<8x32xf32>
    %c0_39 = arith.constant 0 : index
    %c64 = arith.constant 64 : index
    %112 = vector.load %arg17[%c0_39, %c64] : memref<8x128xf32, #tpu.memory_space<vmem>>, vector<8x32xf32>
    tpu.vector_store %arg17[%c0_39, %c64], %111 {strides = array<i32>} : memref<8x128xf32, #tpu.memory_space<vmem>>, vector<8x32xf32>,
    %113 = vector.extract_strided_slice %43 {offsets = [0, 96], sizes = [8, 32], strides = [1, 1]} : vector<8x384xf32> to vector<8x32xf32>
    %114 = vector.extract_strided_slice %43 {offsets = [0, 224], sizes = [8, 32], strides = [1, 1]} : vector<8x384xf32> to vector<8x32xf32>
    %115 = vector.extract_strided_slice %43 {offsets = [0, 352], sizes = [8, 32], strides = [1, 1]} : vector<8x384xf32> to vector<8x32xf32>
    %116 = arith.truncf %113 : vector<8x32xf32> to vector<8x32xbf16>
    %117 = arith.truncf %114 : vector<8x32xf32> to vector<8x32xbf16>
    %118 = arith.truncf %115 : vector<8x32xf32> to vector<8x32xbf16>
    %cst_40 = arith.constant dense<0.000000e+00> : vector<8x8xf32>
    %119 = tpu.matmul %116, %117, %cst_40 {dimension_numbers = #tpu.dot_dimension_numbers<[1], [1], [0], [0], [0, 0, 1, 0], [], []>} : vector<8x32xbf16>, vector<8x32xbf16>, vector<8x8xf32> -> vector<8x8xf32>
    %cst_41 = arith.constant 0.176776692 : f32
    %120 = vector.broadcast %cst_41 : f32 to vector<8x8xf32>
    %121 = arith.mulf %119, %120 : vector<8x8xf32>
    %122 = arith.addf %121, %9 : vector<8x8xf32>
    %cst_42 = arith.constant dense<0xFF800000> : vector<8xf32>
    %123 = vector.multi_reduction <maximumf>, %122, %cst_42 [1] : vector<8x8xf32> to vector<8xf32>
    %124 = vector.shape_cast %123 : vector<8xf32> to vector<8x1xf32>
    %125 = vector.broadcast %124 : vector<8x1xf32> to vector<8x8xf32>
    %126 = arith.subf %122, %125 : vector<8x8xf32>
    %127 = math.exp %126 : vector<8x8xf32>
    %cst_43 = arith.constant dense<0.000000e+00> : vector<8xf32>
    %128 = vector.multi_reduction <add>, %127, %cst_43 [1] : vector<8x8xf32> to vector<8xf32>
    %129 = vector.shape_cast %128 : vector<8xf32> to vector<8x1xf32>
    %130 = tpu.reciprocal %129 {approx = true} : vector<8x1xf32> -> vector<8x1xf32>
    %131 = vector.broadcast %130 : vector<8x1xf32> to vector<8x8xf32>
    %132 = arith.mulf %127, %131 : vector<8x8xf32>
    %133 = arith.truncf %132 : vector<8x8xf32> to vector<8x8xbf16>
    %cst_44 = arith.constant dense<0.000000e+00> : vector<8x32xf32>
    %134 = tpu.matmul %133, %118, %cst_44 {dimension_numbers = #tpu.dot_dimension_numbers<[1], [0], [0], [1], [0, 0, 1, 1], [], []>} : vector<8x8xbf16>, vector<8x32xbf16>, vector<8x32xf32> -> vector<8x32xf32>
    %c0_45 = arith.constant 0 : index
    %c96 = arith.constant 96 : index
    %135 = vector.load %arg17[%c0_45, %c96] : memref<8x128xf32, #tpu.memory_space<vmem>>, vector<8x32xf32>
    tpu.vector_store %arg17[%c0_45, %c96], %134 {strides = array<i32>} : memref<8x128xf32, #tpu.memory_space<vmem>>, vector<8x32xf32>,
    %c0_46 = arith.constant 0 : index
    %c0_47 = arith.constant 0 : index
    %136 = vector.load %arg17[%c0_46, %c0_47] : memref<8x128xf32, #tpu.memory_space<vmem>>, vector<8x128xf32>
    %137 = arith.truncf %136 : vector<8x128xf32> to vector<8x128xbf16>
    %c0_48 = arith.constant 0 : index
    %c0_49 = arith.constant 0 : index
    %c0_50 = arith.constant 0 : index
    %138 = vector.load %arg7[%c0_48, %c0_49, %c0_50] : memref<1x128x128xbf16, #tpu.memory_space<vmem>>, vector<1x128x128xbf16>
    %139 = vector.shape_cast %138 : vector<1x128x128xbf16> to vector<128x128xbf16>
    %cst_51 = arith.constant dense<0.000000e+00> : vector<8x128xf32>
    %140 = tpu.matmul %137, %139, %cst_51 {dimension_numbers = #tpu.dot_dimension_numbers<[1], [0], [0], [1], [0, 0, 1, 1], [], []>} : vector<8x128xbf16>, vector<128x128xbf16>, vector<8x128xf32> -> vector<8x128xf32>
    %141 = arith.addf %3, %140 : vector<8x128xf32>
    %c0_52 = arith.constant 0 : index
    %c0_53 = arith.constant 0 : index
    %c0_54 = arith.constant 0 : index
    %142 = vector.load %arg8[%c0_52, %c0_53, %c0_54] : memref<1x1x128xf32, #tpu.memory_space<vmem>>, vector<1x1x128xf32>
    %143 = vector.shape_cast %142 : vector<1x1x128xf32> to vector<1x128xf32>
    %144 = vector.broadcast %143 : vector<1x128xf32> to vector<8x128xf32>
    %145 = arith.addf %141, %144 : vector<8x128xf32>
    %c0_55 = arith.constant 0 : index
    %c0_56 = arith.constant 0 : index
    %c0_57 = arith.constant 0 : index
    %146 = vector.load %arg9[%c0_55, %c0_56, %c0_57] : memref<1x1x128xf32, #tpu.memory_space<vmem>>, vector<1x1x128xf32>
    %147 = vector.shape_cast %146 : vector<1x1x128xf32> to vector<1x128xf32>
    %c0_58 = arith.constant 0 : index
    %c0_59 = arith.constant 0 : index
    %c0_60 = arith.constant 0 : index
    %148 = vector.load %arg10[%c0_58, %c0_59, %c0_60] : memref<1x1x128xf32, #tpu.memory_space<vmem>>, vector<1x1x128xf32>
    %149 = vector.shape_cast %148 : vector<1x1x128xf32> to vector<1x128xf32>
    %cst_61 = arith.constant dense<0.000000e+00> : vector<8xf32>
    %150 = vector.multi_reduction <add>, %145, %cst_61 [1] : vector<8x128xf32> to vector<8xf32>
    %151 = vector.shape_cast %150 : vector<8xf32> to vector<8x1xf32>
    %cst_62 = arith.constant 1.280000e+02 : f32
    %152 = vector.broadcast %cst_62 : f32 to vector<8x1xf32>
    %153 = arith.divf %151, %152 : vector<8x1xf32>
    %154 = vector.broadcast %153 : vector<8x1xf32> to vector<8x128xf32>
    %155 = arith.subf %145, %154 : vector<8x128xf32>
    %156 = arith.mulf %155, %155 : vector<8x128xf32>
    %cst_63 = arith.constant dense<0.000000e+00> : vector<8xf32>
    %157 = vector.multi_reduction <add>, %156, %cst_63 [1] : vector<8x128xf32> to vector<8xf32>
    %158 = vector.shape_cast %157 : vector<8xf32> to vector<8x1xf32>
    %cst_64 = arith.constant 1.280000e+02 : f32
    %159 = vector.broadcast %cst_64 : f32 to vector<8x1xf32>
    %160 = arith.divf %158, %159 : vector<8x1xf32>
    %161 = vector.broadcast %153 : vector<8x1xf32> to vector<8x128xf32>
    %162 = arith.subf %145, %161 : vector<8x128xf32>
    %cst_65 = arith.constant 9.99999974E-6 : f32
    %163 = vector.broadcast %cst_65 : f32 to vector<8x1xf32>
    %164 = arith.addf %160, %163 : vector<8x1xf32>
    %165 = math.rsqrt %164 : vector<8x1xf32>
    %166 = vector.broadcast %165 : vector<8x1xf32> to vector<8x128xf32>
    %167 = arith.mulf %162, %166 : vector<8x128xf32>
    %168 = vector.broadcast %147 : vector<1x128xf32> to vector<8x128xf32>
    %169 = arith.mulf %167, %168 : vector<8x128xf32>
    %170 = vector.broadcast %149 : vector<1x128xf32> to vector<8x128xf32>
    %171 = arith.addf %169, %170 : vector<8x128xf32>
    %172 = arith.truncf %171 : vector<8x128xf32> to vector<8x128xbf16>
    %c0_66 = arith.constant 0 : index
    %c0_67 = arith.constant 0 : index
    %c0_68 = arith.constant 0 : index
    %173 = vector.load %arg11[%c0_66, %c0_67, %c0_68] : memref<1x128x512xbf16, #tpu.memory_space<vmem>>, vector<1x128x512xbf16>
    %174 = vector.shape_cast %173 : vector<1x128x512xbf16> to vector<128x512xbf16>
    %cst_69 = arith.constant dense<0.000000e+00> : vector<8x512xf32>
    %175 = tpu.matmul %172, %174, %cst_69 {dimension_numbers = #tpu.dot_dimension_numbers<[1], [0], [0], [1], [0, 0, 1, 1], [], []>} : vector<8x128xbf16>, vector<128x512xbf16>, vector<8x512xf32> -> vector<8x512xf32>
    %c0_70 = arith.constant 0 : index
    %c0_71 = arith.constant 0 : index
    %c0_72 = arith.constant 0 : index
    %176 = vector.load %arg12[%c0_70, %c0_71, %c0_72] : memref<1x1x512xf32, #tpu.memory_space<vmem>>, vector<1x1x512xf32>
    %177 = vector.shape_cast %176 : vector<1x1x512xf32> to vector<1x512xf32>
    %178 = vector.broadcast %177 : vector<1x512xf32> to vector<8x512xf32>
    %179 = arith.addf %175, %178 : vector<8x512xf32>
    %cst_73 = arith.constant 1.702000e+00 : f32
    %180 = vector.broadcast %cst_73 : f32 to vector<8x512xf32>
    %181 = arith.mulf %180, %179 : vector<8x512xf32>
    %182 = arith.negf %181 : vector<8x512xf32>
    %183 = math.exp %182 : vector<8x512xf32>
    %cst_74 = arith.constant 1.000000e+00 : f32
    %184 = vector.broadcast %cst_74 : f32 to vector<8x512xf32>
    %185 = arith.addf %184, %183 : vector<8x512xf32>
    %186 = arith.divf %184, %185 : vector<8x512xf32>
    %187 = arith.mulf %179, %186 : vector<8x512xf32>
    %188 = arith.truncf %187 : vector<8x512xf32> to vector<8x512xbf16>
    %c0_75 = arith.constant 0 : index
    %c0_76 = arith.constant 0 : index
    %c0_77 = arith.constant 0 : index
    %189 = vector.load %arg13[%c0_75, %c0_76, %c0_77] : memref<1x512x128xbf16, #tpu.memory_space<vmem>>, vector<1x512x128xbf16>
    %190 = vector.shape_cast %189 : vector<1x512x128xbf16> to vector<512x128xbf16>
    %cst_78 = arith.constant dense<0.000000e+00> : vector<8x128xf32>
    %191 = tpu.matmul %188, %190, %cst_78 {dimension_numbers = #tpu.dot_dimension_numbers<[1], [0], [0], [1], [0, 0, 1, 1], [], []>} : vector<8x512xbf16>, vector<512x128xbf16>, vector<8x128xf32> -> vector<8x128xf32>
    %192 = arith.addf %145, %191 : vector<8x128xf32>
    %c0_79 = arith.constant 0 : index
    %c0_80 = arith.constant 0 : index
    %c0_81 = arith.constant 0 : index
    %193 = vector.load %arg14[%c0_79, %c0_80, %c0_81] : memref<1x1x128xf32, #tpu.memory_space<vmem>>, vector<1x1x128xf32>
    %194 = vector.shape_cast %193 : vector<1x1x128xf32> to vector<1x128xf32>
    %195 = vector.broadcast %194 : vector<1x128xf32> to vector<8x128xf32>
    %196 = arith.addf %192, %195 : vector<8x128xf32>
    %c0_82 = arith.constant 0 : index
    %c0_83 = arith.constant 0 : index
    %197 = vector.load %arg16[%c0_82, %c0_83] : memref<8x128xf32, #tpu.memory_space<vmem>>, vector<8x128xf32>
    tpu.vector_store %arg16[%c0_82, %c0_83], %196 {strides = array<i32>} : memref<8x128xf32, #tpu.memory_space<vmem>>, vector<8x128xf32>,
    %c1_i32 = arith.constant 1 : i32
    %198 = arith.cmpi eq, %arg1, %c1_i32 : i32
    %199 = arith.extui %198 : i1 to i32
    %c0_i32_84 = arith.constant 0 : i32
    %200 = arith.cmpi ne, %199, %c0_i32_84 : i32
    scf.if %200 {
      %c0_85 = arith.constant 0 : index
      %c0_86 = arith.constant 0 : index
      %201 = vector.load %arg15[%c0_85, %c0_86] : memref<8x128xf32, #tpu.memory_space<vmem>>, vector<8x128xf32>
      tpu.vector_store %arg15[%c0_85, %c0_86], %196 {strides = array<i32>} : memref<8x128xf32, #tpu.memory_space<vmem>>, vector<8x128xf32>,
    } else {
    }
    return
  }
  func.func @transform_0(%arg0: i32, %arg1: i32) -> (i32, i32) {
    %c0_i32 = arith.constant 0 : i32
    %c0_i32_0 = arith.constant 0 : i32
    return %arg0, %c0_i32 : i32, i32
  }
  func.func @transform_1(%arg0: i32, %arg1: i32) -> (i32, i32, i32) {
    %c0_i32 = arith.constant 0 : i32
    %c0_i32_0 = arith.constant 0 : i32
    %c0_i32_1 = arith.constant 0 : i32
    return %arg1, %c0_i32, %c0_i32_0 : i32, i32, i32
  }
  func.func @transform_2(%arg0: i32, %arg1: i32) -> (i32, i32, i32) {
    %c0_i32 = arith.constant 0 : i32
    %c0_i32_0 = arith.constant 0 : i32
    %c0_i32_1 = arith.constant 0 : i32
    return %arg1, %c0_i32, %c0_i32_0 : i32, i32, i32
  }
  func.func @transform_3(%arg0: i32, %arg1: i32) -> (i32, i32, i32) {
    %c0_i32 = arith.constant 0 : i32
    %c0_i32_0 = arith.constant 0 : i32
    %c0_i32_1 = arith.constant 0 : i32
    return %arg1, %c0_i32, %c0_i32_0 : i32, i32, i32
  }
  func.func @transform_4(%arg0: i32, %arg1: i32) -> (i32, i32, i32) {
    %c0_i32 = arith.constant 0 : i32
    %c0_i32_0 = arith.constant 0 : i32
    %c0_i32_1 = arith.constant 0 : i32
    return %arg1, %c0_i32, %c0_i32_0 : i32, i32, i32
  }
  func.func @transform_5(%arg0: i32, %arg1: i32) -> (i32, i32, i32) {
    %c0_i32 = arith.constant 0 : i32
    %c0_i32_0 = arith.constant 0 : i32
    %c0_i32_1 = arith.constant 0 : i32
    return %arg1, %c0_i32, %c0_i32_0 : i32, i32, i32
  }
  func.func @transform_6(%arg0: i32, %arg1: i32) -> (i32, i32, i32) {
    %c0_i32 = arith.constant 0 : i32
    %c0_i32_0 = arith.constant 0 : i32
    %c0_i32_1 = arith.constant 0 : i32
    return %arg1, %c0_i32, %c0_i32_0 : i32, i32, i32
  }
  func.func @transform_7(%arg0: i32, %arg1: i32) -> (i32, i32, i32) {
    %c0_i32 = arith.constant 0 : i32
    %c0_i32_0 = arith.constant 0 : i32
    %c0_i32_1 = arith.constant 0 : i32
    return %arg1, %c0_i32, %c0_i32_0 : i32, i32, i32
  }
  func.func @transform_8(%arg0: i32, %arg1: i32) -> (i32, i32, i32) {
    %c0_i32 = arith.constant 0 : i32
    %c0_i32_0 = arith.constant 0 : i32
    %c0_i32_1 = arith.constant 0 : i32
    return %arg1, %c0_i32, %c0_i32_0 : i32, i32, i32
  }
  func.func @transform_9(%arg0: i32, %arg1: i32) -> (i32, i32, i32) {
    %c0_i32 = arith.constant 0 : i32
    %c0_i32_0 = arith.constant 0 : i32
    %c0_i32_1 = arith.constant 0 : i32
    return %arg1, %c0_i32, %c0_i32_0 : i32, i32, i32
  }
  func.func @transform_10(%arg0: i32, %arg1: i32) -> (i32, i32, i32) {
    %c0_i32 = arith.constant 0 : i32
    %c0_i32_0 = arith.constant 0 : i32
    %c0_i32_1 = arith.constant 0 : i32
    return %arg1, %c0_i32, %c0_i32_0 : i32, i32, i32
  }
  func.func @transform_11(%arg0: i32, %arg1: i32) -> (i32, i32, i32) {
    %c0_i32 = arith.constant 0 : i32
    %c0_i32_0 = arith.constant 0 : i32
    %c0_i32_1 = arith.constant 0 : i32
    return %arg1, %c0_i32, %c0_i32_0 : i32, i32, i32
  }
  func.func @transform_12(%arg0: i32, %arg1: i32) -> (i32, i32, i32) {
    %c0_i32 = arith.constant 0 : i32
    %c0_i32_0 = arith.constant 0 : i32
    %c0_i32_1 = arith.constant 0 : i32
    return %arg1, %c0_i32, %c0_i32_0 : i32, i32, i32
  }
  func.func @transform_13(%arg0: i32, %arg1: i32) -> (i32, i32) {
    %c0_i32 = arith.constant 0 : i32
    %c0_i32_0 = arith.constant 0 : i32
    return %arg0, %c0_i32 : i32, i32
  }
}

</mosaic_0001>

<bundles_post_ra>
// kernel: tpu_custom_call.1
= control target key start
LH: loop header
LB: loop body
LE: loop exit
PB: predicated region body
PF: predicated region fallthrough
CT: control target
= control target key end

     0   :  { %s4505_s0 = inlined_call_operand.hbm [shape: f32[16,128], index: 0, kind: input, shape index: {}]   ;;  %s4506_s1 = inlined_call_operand.hbm [shape: f32[2,1,128], index: 1, kind: input, shape index: {}]   ;;  %s4507_s2 = inlined_call_operand.hbm [shape: f32[2,1,128], index: 2, kind: input, shape index: {}]   ;;  %s4508_s3 = inlined_call_operand.hbm [shape: bf16[2,128,384], index: 3, kind: input, shape index: {}]   ;;  %s4509_s4 = inlined_call_operand.vmem [shape: f32[2,1,384], index: 4, kind: input, shape index: {}]   ;;  %s4510_s5 = inlined_call_operand.hbm [shape: bf16[2,128,128], index: 5, kind: input, shape index: {}]   ;;  %s4511_s6 = inlined_call_operand.vmem [shape: f32[2,1,128], index: 6, kind: input, shape index: {}]   ;;  %s4512_s7 = inlined_call_operand.vmem [shape: f32[2,1,128], index: 7, kind: input, shape index: {}]   ;;  %s4513_s8 = inlined_call_operand.vmem [shape: f32[2,1,128], index: 8, kind: input, shape index: {}]   ;;  %s4514_s9 = inlined_call_operand.hbm [shape: bf16[2,128,512], index: 9, kind: input, shape index: {}]   ;;  %s4515_s10 = inlined_call_operand.vmem [shape: f32[2,1,512], index: 10, kind: input, shape index: {}]   ;;  %s4516_s11 = inlined_call_operand.hbm [shape: bf16[2,512,128], index: 11, kind: input, shape index: {}]   ;;  %s4517_s12 = inlined_call_operand.vmem [shape: f32[2,1,128], index: 12, kind: input, shape index: {}]   ;;  %s4518_s13 = inlined_call_operand.hbm [shape: f32[16,128], index: 13, kind: output, shape index: {}]  }
   0x1   :  { %4555 = sst [smem:[#allocation42_spill]] %s4505_s0 }
   0x2   :  { %4556 = sst [smem:[#allocation43_spill]] %s4506_s1 }
   0x3   :  { %4557 = sst [smem:[#allocation44_spill]] %s4507_s2 }
   0x4   :  { %4558 = sst [smem:[#allocation45_spill]] %s4508_s3 }
   0x5   :  { %4559 = sst [smem:[#allocation46_spill]] %s4509_s4 }
   0x6   :  { %4560 = sst [smem:[#allocation47_spill]] %s4510_s5 }
   0x7   :  { %4561 = sst [smem:[#allocation48_spill]] %s4511_s6 }
   0x8   :  { %4562 = sst [smem:[#allocation49_spill]] %s4512_s7 }
   0x9   :  { %4563 = sst [smem:[#allocation50_spill]] %s4513_s8 }
   0xa   :  { %4564 = sst [smem:[#allocation51_spill]] %s4514_s9 }
   0xb   :  { %4565 = sst [smem:[#allocation52_spill]] %s4515_s10 }
   0xc   :  { %4566 = sst [smem:[#allocation53_spill]] %s4516_s11 }
   0xd   :  { %4567 = sst [smem:[#allocation54_spill]] %s4517_s12 }
   0xe   :  { %4568 = sst [smem:[#allocation55_spill]] %s4518_s13 }
   0xf   :  { %18 = vsyncpa [#allocation5], 0 }
  0x10   :  { %20 = vsyncpa [#allocation5 + $0x1], 0 }
  0x11   :  { %21 = vsyncpa [#allocation8], 0 }
  0x12   :  { %23 = vsyncpa [#allocation8 + $0x1], 0 }
  0x13   :  { %24 = vsyncpa [#allocation11], 0 }
  0x14   :  { %26 = vsyncpa [#allocation11 + $0x1], 0 }
  0x15   :  { %27 = vsyncpa [#allocation14], 0 }
  0x16   :  { %29 = vsyncpa [#allocation14 + $0x1], 0 }
  0x17   :  { %30 = vsyncpa [#allocation6], 0 }
  0x18   :  { %32 = vsyncpa [#allocation6 + $0x1], 0  ;;  %s3706_s25 = smov 0   ;;  %s3708_s26 = smov 0  }
  0x19   :  { %s3710_s27 = smov 0   ;;  %s3712_s28 = smov 0  }
  0x1a   :  { %s3714_s29 = smov 0   ;;  %s3716_s30 = smov 0  }
  0x1b   :  { %s3718_s14 = smov 0   ;;  %s3720_s15 = smov 0  }
  0x1c   :  { %s3722_s16 = smov 0   ;;  %s3724_s17 = smov 0  }
  0x1d   :  { %s3726_s18 = smov 0  }
  0x1e LB: > { %4569 = sst [smem:[#allocation22_spill]] %s3578_s26  ;;  %p4522_p0 = scmp.eq.s32.totalorder %s3614_s18, 0  ;;  %s3614_s18 = sphi %s3726_s18, %s38_s18   ;;  %s3610_s17 = sphi %s3724_s17, %s4654_s17   ;;  %s3606_s16 = sphi %s3722_s16, %s4653_s16   ;;  %s3602_s15 = sphi %s3720_s15, %s4652_s15   ;;  %s3598_s14 = sphi %s3718_s14, %s4651_s14   ;;  %s3594_s30 = sphi %s3716_s30, %s4650_s30   ;;  %s3590_s29 = sphi %s3714_s29, %s4649_s29   ;;  %s3586_s28 = sphi %s3712_s28, %s4648_s28   ;;  %s3582_s27 = sphi %s3710_s27, %s4647_s27   ;;  %s3578_s26 = sphi %s3708_s26, %s4646_s26   ;;  %s3574_s25 = sphi %s3706_s25, %s4645_s25  }
  0x1f   : > { %4570 = sst [smem:[#allocation23_spill]] %s3582_s27  ;;  %p90_p1 = scmp.ne.s32.totalorder %s3582_s27, %s3578_s26 }
  0x20   : > { %4571 = sst [smem:[#allocation24_spill]] %s3586_s28  ;;  %p4521_p3 = scmp.lt.s32.totalorder %s3614_s18, 4 }
  0x21   : > { %4572 = sst [smem:[#allocation25_spill]] %s3590_s29  ;;  %p92_p4 = por %p90_p1, %p4522_p0 }
  0x22   : > { %4573 = sst [smem:[#allocation26_spill]] %s3594_s30  ;;  %s3771_s20 = sand.u32 1, %s3614_s18  }
  0x23   : > { %4574 = sst [smem:[#allocation27_spill]] %s3598_s14  ;;  %s3774_s21 = sand.u32 1, %s3582_s27  }
  0x24   : > { %4575 = sst [smem:[#allocation28_spill]] %s3602_s15  ;;  %s2658_s22 = sshll.u32 %s3606_s16, 4 }
  0x25   : > { %4576 = sst [smem:[#allocation29_spill]] %s3606_s16  ;;  %s4579_s1 = sld [smem:[#allocation43_spill]] }
  0x26   : > { %4577 = sst [smem:[#allocation30_spill]] %s3610_s17  ;;  %s453_s19 = scalar_lea.vmem [#allocation7], %s3774_s21 }
  0x27   : > { %4578 = sst [smem:[#allocation31_spill]] %s3614_s18  ;;  %s460_s15 = sshll.u32 %s453_s19, 4  ;;  %s3783_s15 = int_to_ptr.vmem [resolvable:$true] %s460_s15 }
  0x28   : > { %p3787_p5 = pnand %p4521_p3, %p92_p4  ;;  %s4581_s2 = sld [smem:[#allocation44_spill]] }
  0x29   : > { %s4523_s24 = scalar_lea.sflag [#allocation8], %s3771_s20 }
  0x2a   : > { %s4580_s12 = scalar_select %p3787_p5, 1, 0 }
  0x2b   : > { %s3780_s13 = scalar_lea.hbm %s4579_s1, %s2658_s22  ;;  %p3801_p7 = pneg %p3787_p5 }
  0x2c   : > { %s3270_s8 = scalar_lea.hbm %s3780_s13, 16  ;;  %s3275_s14 = scalar_lea.hbm %s4579_s1, 32 }
  0x2d   : > { %p3271_p6 = scmp.ne.s32.totalorder %s3780_s13, %s3270_s8  ;;  %p3276_p10 = scmp.lt.u32.totalorder %s3780_s13, %s4579_s1 }
  0x2e   : > { %s3794_s23 = scalar_lea.hbm %s4581_s2, %s2658_s22  ;;  %p3277_p11 = scmp.lt.u32.totalorder %s3275_s14, %s3270_s8 }
  0x2f   : > { %p3273_p8 = pnand %p3801_p7, %p3271_p6  ;;  %p3279_p13 = scmp.lt.u32.totalorder %s3270_s8, %s3780_s13 }
  0x30   : > { %p3278_p12 = por %p3277_p11, %p3276_p10 }
  0x31   : > { %p3274_p9 = pneg %p3273_p8 }
  0x32   : > { %p3280_p1 = por %p3279_p13, %p3278_p12 }
  0x34   : > { %p3281_p4 = pnand %p3280_p1, %p3274_p9 }
  0x36   : > { %3284 = shalt.err (!%p3281_p4)
}
  0x37   : > { %s3285_s22 = scalar_lea.vmem %s3783_s15, 16  ;;  %s3616_s6 = smov [#allocation7]  }
  0x38   : > { %p3286_p6 = scmp.ne.s32.totalorder %s3783_s15, %s3285_s22  ;;  %s3290_s19 = sshll.u32 %s3616_s6, 4  ;;  %s3291_s19 = int_to_ptr.vmem [resolvable:$false] %s3290_s19 }
  0x39   : > { %s3292_s4 = scalar_lea.vmem %s3291_s19, 32  ;;  %p3293_p2 = scmp.lt.s32.totalorder %s3783_s15, %s3291_s19 }
  0x3a   : > { %p3288_p8 = pnand %p3286_p6, %p3801_p7  ;;  %p3294_p0 = scmp.lt.s32.totalorder %s3292_s4, %s3285_s22 }
  0x3c   : > { %p3289_p3 = pneg %p3288_p8  ;;  %p3295_p10 = por %p3294_p0, %p3293_p2 }
  0x3e   : > { %p3296_p11 = pnand %p3295_p10, %p3289_p3 }
  0x40   : > { %3299 = shalt.err (!%p3296_p11)
}
  0x41   : > { %2992 = dma.hbm_to_vmem [thread:$0]  (!%p3787_p5), %s3780_s13, 16, %s3783_s15, %s4523_s24  }
  0x42   : > { %p2670_p9 = scmp.ge.s32.totalorder %s3614_s18, 1  ;;  %p604_p12 = scmp.lt.s32.totalorder %s3614_s18, 5 }
  0x43   : > { %s2966_s8 = smul.u32 192, %s3774_s21  ;;  %s4585_s3 = sld [smem:[#allocation45_spill]] }
  0x44   : > { %p3829_p0 = pnand %p2670_p9, %p604_p12  ;;  %s2967_s10 = smul.u32 3072, %s3606_s16 }
  0x45   : > { %s488_s4 = scalar_lea.vmem [#allocation10], %s2966_s8  ;;  %s2664_s13 = sshll.u32 %s3774_s21, 8 }
  0x46   : > { %s4583_s14 = scalar_select %p3829_p0, 1, 0 }
  0x47   : > { %s495_s1 = sshll.u32 %s488_s4, 4  ;;  %s4527_s15 = scalar_lea.sflag [#allocation11], %s3771_s20  ;;  %s3839_s1 = int_to_ptr.vmem [resolvable:$true] %s495_s1 }
  0x48   : > { %4584 = sst [smem:[#allocation32_spill]] %s4583_s14 }
  0x49   : > { %s3837_s19 = scalar_lea.hbm %s4585_s3, %s2967_s10  ;;  %s3305_s10 = scalar_lea.hbm %s4585_s3, 6144 }
  0x4a   : > { %s3300_s24 = scalar_lea.hbm %s3837_s19, 3072  ;;  %p3306_p1 = scmp.lt.u32.totalorder %s3837_s19, %s4585_s3 }
  0x4b   : > { %p3301_p2 = scmp.ne.s32.totalorder %s3837_s19, %s3300_s24  ;;  %p3307_p4 = scmp.lt.u32.totalorder %s3305_s10, %s3300_s24 }
  0x4c   : > { %p3309_p8 = scmp.lt.u32.totalorder %s3300_s24, %s3837_s19 }
  0x4d   : > { %p3303_p3 = pnand %p3301_p2, %p3801_p7  ;;  %p3308_p6 = por %p3307_p4, %p3306_p1 }
  0x4f   : > { %p3304_p13 = pneg %p3303_p3  ;;  %p3310_p10 = por %p3309_p8, %p3308_p6 }
  0x51   : > { %p3311_p11 = pnand %p3310_p10, %p3304_p13 }
  0x53   : > { %3314 = shalt.err (!%p3311_p11)
}
  0x54   : > { %s3315_s8 = scalar_lea.vmem %s3839_s1, 3072  ;;  %s3617_s5 = smov [#allocation10]  }
  0x55   : > { %p3316_p9 = scmp.ne.s32.totalorder %s3839_s1, %s3315_s8  ;;  %s3320_s14 = sshll.u32 %s3617_s5, 4  ;;  %s3321_s14 = int_to_ptr.vmem [resolvable:$false] %s3320_s14 }
  0x56   : > { %s3322_s4 = scalar_lea.vmem %s3321_s14, 6144  ;;  %p3323_p3 = scmp.lt.s32.totalorder %s3839_s1, %s3321_s14 }
  0x57   : > { %p3318_p12 = pnand %p3316_p9, %p3801_p7  ;;  %p3324_p0 = scmp.lt.s32.totalorder %s3322_s4, %s3315_s8 }
  0x59   : > { %p3319_p2 = pneg %p3318_p12  ;;  %p3325_p1 = por %p3324_p0, %p3323_p3 }
  0x5b   : > { %p3326_p4 = pnand %p3325_p1, %p3319_p2 }
  0x5d   : > { %3329 = shalt.err (!%p3326_p4)
}
  0x5e   : > { %s3618_s24 = smov 192   ;;  %s3619_s10 = smov 12  }
  0x5f   : > { %2998 = dma.hbm_to_vmem [thread:$0]  (!%p3787_p5), %s3837_s19, 3072, %s3839_s1, %s4527_s15, %s3618_s24, %s3618_s24, %s3619_s10  }
  0x60   : > { %s2798_s22 = sshll.u32 %s3606_s16, 12  ;;  %s4586_s9 = sld [smem:[#allocation51_spill]] }
  0x61   : > { %s555_s14 = scalar_lea.vmem [#allocation13], %s2664_s13  ;;  %s4528_s3 = scalar_lea.sflag [#allocation14], %s3771_s20 }
  0x62   : > { %s562_s4 = sshll.u32 %s555_s14, 4  ;;  %s3876_s4 = int_to_ptr.vmem [resolvable:$true] %s562_s4 }
  0x66   : > { %s3872_s5 = scalar_lea.hbm %s4586_s9, %s2798_s22  ;;  %s3335_s24 = scalar_lea.hbm %s4586_s9, 8192 }
  0x67   : > { %s3330_s2 = scalar_lea.hbm %s3872_s5, 4096  ;;  %p3336_p8 = scmp.lt.u32.totalorder %s3872_s5, %s4586_s9 }
  0x68   : > { %p3331_p0 = scmp.ne.s32.totalorder %s3872_s5, %s3330_s2  ;;  %p3337_p10 = scmp.lt.u32.totalorder %s3335_s24, %s3330_s2 }
  0x69   : > { %p3339_p9 = scmp.lt.u32.totalorder %s3330_s2, %s3872_s5 }
  0x6a   : > { %p3333_p13 = pnand %p3331_p0, %p3801_p7  ;;  %p3338_p11 = por %p3337_p10, %p3336_p8 }
  0x6c   : > { %p3334_p6 = pneg %p3333_p13  ;;  %p3340_p12 = por %p3339_p9, %p3338_p11 }
  0x6e   : > { %p3341_p2 = pnand %p3340_p12, %p3334_p6 }
  0x70   : > { %3344 = shalt.err (!%p3341_p2)
}
  0x71   : > { %s3345_s8 = scalar_lea.vmem %s3876_s4, 4096  ;;  %s3620_s14 = smov [#allocation13]  }
  0x72   : > { %p3346_p3 = scmp.ne.s32.totalorder %s3876_s4, %s3345_s8  ;;  %s3350_s1 = sshll.u32 %s3620_s14, 4  ;;  %s3351_s1 = int_to_ptr.vmem [resolvable:$false] %s3350_s1 }
  0x73   : > { %s3352_s19 = scalar_lea.vmem %s3351_s1, 8192  ;;  %p3353_p0 = scmp.lt.s32.totalorder %s3876_s4, %s3351_s1 }
  0x74   : > { %p3348_p1 = pnand %p3346_p3, %p3801_p7  ;;  %p3354_p13 = scmp.lt.s32.totalorder %s3352_s19, %s3345_s8 }
  0x76   : > { %p3349_p4 = pneg %p3348_p1  ;;  %p3355_p8 = por %p3354_p13, %p3353_p0 }
  0x78   : > { %p3356_p10 = pnand %p3355_p8, %p3349_p4 }
  0x7a   : > { %3359 = shalt.err (!%p3356_p10)
}
  0x7b   : > { %s3621_s2 = smov 256   ;;  %s3622_s24 = smov 16  }
  0x7c   : > { %3004 = dma.hbm_to_vmem [thread:$0]  (!%p3787_p5), %s3872_s5, 4096, %s3876_s4, %s4528_s3, %s3621_s2, %s3621_s2, %s3622_s24  }
  0x7d   : > { %s4587_s11 = sld [smem:[#allocation53_spill]]  ;;  %s583_s14 = scalar_lea.vmem [#allocation15], %s2664_s13 }
  0x7e   : > { %s590_s1 = sshll.u32 %s583_s14, 4  ;;  %s3914_s19 = sadd.s32 4294967295, %s3614_s18   ;;  %s3911_s1 = int_to_ptr.vmem [resolvable:$true] %s590_s1 }
  0x7f   : > { %4588 = sst [smem:[#allocation33_spill]] %s3914_s19  ;;  %s2653_s15 = sadd.s32 4294967294, %s3614_s18  }
  0x80   : > { %s47_s5 = sadd.s32 1, %s3606_s16  ;;  %s57_s4 = sadd.s32 1, %s3594_s30 }
  0x81   : > { %p48_p6 = scmp.ge.s32.totalorder %s47_s5, 2  ;;  %p64_p11 = scmp.ne.s32.totalorder %s3594_s30, %s3590_s29 }
  0x82   : > { %p4590_p9 = scmp.eq.s32.totalorder %s3614_s18, 0  ;;  %p70_p2 = scmp.ne.s32.totalorder %s3590_s29, %s3586_s28 }
  0x83   : > { %s3907_s8 = scalar_lea.hbm %s4587_s11, %s2798_s22  ;;  %s50_s22 = sadd.s32 1, %s3610_s17 }
  0x84   : > { %s4656_s5 = smov (%p48_p6, %s47_s5), 0  ;;  %s4658_s22 = smov (!%p48_p6, %s50_s22), %s3610_s17 }
  0x85   : > { %4589 = sst [smem:[#allocation34_spill]] %s4656_s5  ;;  %p3930_p12 = por %p4590_p9, %p64_p11 }
  0x86   : > { %p52_p3 = scmp.ge.s32.totalorder %s4658_s22, 2  ;;  %p71_p1 = scmp.eq.s32.totalorder %s3914_s19, 0 }
  0x87   : > { %s80_s2 = ssub.s32 %s3606_s16, %s4656_s5  ;;  %p406_p4 = scmp.eq.s32.totalorder %s3914_s19, 3 }
  0x88   : > { %s4660_s22 = smov (%p52_p3, %s4658_s22), 0  ;;  %p3945_p0 = por %p71_p1, %p70_p2 }
  0x89   : > { %4592 = sst [smem:[#allocation35_spill]] %s4660_s22  ;;  %p81_p13 = scmp.eq.s32.totalorder %s80_s2, 0 }
  0x8a   : > { %s4593_s24 = scalar_select %p3945_p0, 1, 0 }
  0x8b   : > { %s54_s10 = ssub.s32 %s3610_s17, %s4660_s22  ;;  %p4595_p8 = scmp.ne.s32.totalorder %s3578_s26, %s3574_s25 }
  0x8c   : > { %4594 = sst [smem:[#allocation36_spill]] %s4593_s24  ;;  %p55_p6 = scmp.eq.s32.totalorder %s54_s10, 0 }
  0x8d   : > { %p3954_p10 = por %p4595_p8, %p71_p1  ;;  %p3961_p9 = por %p406_p4, %p64_p11 }
  0x8e   : > { %s4600_s3 = sadd.s32 1, %s3582_s27  ;;  %p412_p3 = scmp.eq.s32.totalorder %s2653_s15, 3 }
  0x8f   : > { %s4596_s6 = scalar_select %p3954_p10, 1, 0 }
  0x90   : > { %s4598_s14 = scalar_select %p3961_p9, 1, 0 }
  0x91   : > { %4597 = sst [smem:[#allocation37_spill]] %s4596_s6  ;;  %s432_s22 = sand.u32 1, %s3594_s30  }
  0x92   : > { %4599 = sst [smem:[#allocation38_spill]] %s4598_s14  ;;  %s2656_s25 = sshll.u32 %s432_s22, 3 }
  0x93   : > { %s3968_s9 = scalar_select %p81_p13, %s3582_s27, %s4600_s3  }
  0x94   : > { %s3971_s2 = scalar_select %p55_p6, %s3594_s30, %s57_s4  }
  0x95   : > { %4601 = sst [smem:[#allocation39_spill]] %s3968_s9  ;;  %p3977_p1 = por %p412_p3, %p70_p2 }
  0x96   : > { %4602 = sst [smem:[#allocation40_spill]] %s3971_s2  ;;  %s2657_s10 = sshll.u32 %s3610_s17, 7 }
  0x97   : > { %s4603_s5 = scalar_select %p3977_p1, 1, 0 }
  0x98   : > { %s436_s6 = scalar_lea.vmem [#allocation4], %s2656_s25  ;;  %s4605_s0 = sld [smem:[#allocation42_spill]] }
  0x99   : > { %4604 = sst [smem:[#allocation41_spill]] %s4603_s5  ;;  %s443_s26 = sshll.u32 %s436_s6, 4  ;;  %s3987_s26 = int_to_ptr.vmem [resolvable:$true] %s443_s26 }
  0x9a   : > { %p4606_p11 = scmp.lt.s32.totalorder %s3614_s18, 4  ;;  %s470_s15 = scalar_lea.vmem [#allocation9], %s3774_s21 }
  0x9b   : > { %s477_s4 = sshll.u32 %s470_s15, 4  ;;  %s2661_s6 = sshll.u32 %s3774_s21, 6  ;;  %s3999_s4 = int_to_ptr.vmem [resolvable:$true] %s477_s4 }
  0x9c   : > { %p3993_p2 = pnand %p4606_p11, %p3930_p12  ;;  %s433_s19 = scalar_lea.sflag [#allocation5], %s432_s22 }
  0x9e   : > { %s3985_s14 = scalar_lea.hbm %s4605_s0, %s2657_s10  ;;  %p3362_p13 = pneg %p3993_p2 }
  0x9f   : > { %s3360_s24 = scalar_lea.hbm %s3985_s14, 128  ;;  %s3365_s10 = scalar_lea.hbm %s4605_s0, 256 }
  0xa0   : > { %p3361_p4 = scmp.ne.s32.totalorder %s3985_s14, %s3360_s24  ;;  %p3366_p12 = scmp.lt.u32.totalorder %s3985_s14, %s4605_s0 }
  0xa1   : > { %p3367_p3 = scmp.lt.u32.totalorder %s3365_s10, %s3360_s24  ;;  %p3369_p1 = scmp.lt.u32.totalorder %s3360_s24, %s3985_s14 }
  0xa2   : > { %p3363_p8 = pnand %p3362_p13, %p3361_p4 }
  0xa3   : > { %p3368_p11 = por %p3367_p3, %p3366_p12 }
  0xa4   : > { %p3364_p6 = pneg %p3363_p8 }
  0xa5   : > { %p3370_p9 = por %p3369_p1, %p3368_p11 }
  0xa7   : > { %p3371_p10 = pnand %p3370_p9, %p3364_p6 }
  0xa9   : > { %3374 = shalt.err (!%p3371_p10)
}
  0xaa   : > { %s3375_s22 = scalar_lea.vmem %s3987_s26, 128  ;;  %s3623_s15 = smov [#allocation4]  }
  0xab   : > { %p3376_p4 = scmp.ne.s32.totalorder %s3987_s26, %s3375_s22  ;;  %s3380_s13 = sshll.u32 %s3623_s15, 4  ;;  %s3381_s13 = int_to_ptr.vmem [resolvable:$false] %s3380_s13 }
  0xac   : > { %s3382_s17 = scalar_lea.vmem %s3381_s13, 256  ;;  %p3383_p5 = scmp.lt.s32.totalorder %s3987_s26, %s3381_s13 }
  0xad   : > { %p3378_p8 = pnand %p3376_p4, %p3362_p13  ;;  %p3384_p12 = scmp.lt.s32.totalorder %s3382_s17, %s3375_s22 }
  0xaf   : > { %p3379_p0 = pneg %p3378_p8  ;;  %p3385_p3 = por %p3384_p12, %p3383_p5 }
  0xb1   : > { %p3386_p1 = pnand %p3385_p3, %p3379_p0 }
  0xb3   : > { %3389 = shalt.err (!%p3386_p1)
}
  0xb4   : > { %2989 = dma.hbm_to_vmem [thread:$0]  (!%p3993_p2), %s3985_s14, 128, %s3987_s26, %s433_s19  }
  0xb5   : > { %s3390_s2 = scalar_lea.hbm %s3794_s23, 16  ;;  %s4608_s10 = sld [smem:[#allocation44_spill]] }
  0xb6   : > { %p3391_p10 = scmp.ne.s32.totalorder %s3794_s23, %s3390_s2  ;;  %p3399_p11 = scmp.lt.u32.totalorder %s3390_s2, %s3794_s23 }
  0xb8   : > { %p3393_p9 = pnand %p3391_p10, %p3801_p7 }
  0xba   : > { %p3394_p13 = pneg %p3393_p9 }
  0xbb   : > { %s3395_s22 = scalar_lea.hbm %s4608_s10, 32  ;;  %p3396_p5 = scmp.lt.u32.totalorder %s3794_s23, %s4608_s10 }
  0xbc   : > { %p3397_p0 = scmp.lt.u32.totalorder %s3395_s22, %s3390_s2 }
  0xbe   : > { %p3398_p6 = por %p3397_p0, %p3396_p5 }
  0xc0   : > { %p3400_p4 = por %p3399_p11, %p3398_p6 }
  0xc2   : > { %p3401_p8 = pnand %p3400_p4, %p3394_p13 }
  0xc4   : > { %3404 = shalt.err (!%p3401_p8)
}
  0xc5   : > { %s3405_s26 = scalar_lea.vmem %s3999_s4, 16  ;;  %s3624_s14 = smov [#allocation9]  }
  0xc6   : > { %p3406_p2 = scmp.ne.s32.totalorder %s3999_s4, %s3405_s26  ;;  %s3410_s3 = sshll.u32 %s3624_s14, 4  ;;  %s3411_s3 = int_to_ptr.vmem [resolvable:$false] %s3410_s3 }
  0xc7   : > { %s3412_s19 = scalar_lea.vmem %s3411_s3, 32  ;;  %p3413_p1 = scmp.lt.s32.totalorder %s3999_s4, %s3411_s3 }
  0xc8   : > { %p3408_p12 = pnand %p3406_p2, %p3801_p7  ;;  %p3414_p10 = scmp.lt.s32.totalorder %s3412_s19, %s3405_s26 }
  0xca   : > { %p3409_p3 = pneg %p3408_p12  ;;  %p3415_p9 = por %p3414_p10, %p3413_p1 }
  0xcc   : > { %p3416_p5 = pnand %p3415_p9, %p3409_p3 }
  0xce   : > { %3419 = shalt.err (!%p3416_p5)
}
  0xcf   : > { %p4609_p13 = scmp.ne.s32.totalorder %s4580_s12, 0  ;;  %s4610_s17 = scalar_lea.sflag [#allocation8], %s3771_s20 }
  0xd0   : > { %s2797_s2 = sshll.u32 %s3606_s16, 10  ;;  %s4611_s10 = sld [smem:[#allocation47_spill]] }
  0xd1   : > { %2995 = dma.hbm_to_vmem [thread:$0]  (!%p4609_p13), %s3794_s23, 16, %s3999_s4, %s4610_s17  }
  0xd2   : > { %s516_s15 = scalar_lea.vmem [#allocation12], %s2661_s6 }
  0xd3   : > { %s523_s13 = sshll.u32 %s516_s15, 4  ;;  %s4057_s13 = int_to_ptr.vmem [resolvable:$true] %s523_s13 }
  0xd6   : > { %s4053_s22 = scalar_lea.hbm %s4611_s10, %s2797_s2  ;;  %s3425_s14 = scalar_lea.hbm %s4611_s10, 2048 }
  0xd7   : > { %s3420_s26 = scalar_lea.hbm %s4053_s22, 1024  ;;  %p3426_p4 = scmp.lt.u32.totalorder %s4053_s22, %s4611_s10 }
  0xd8   : > { %p3421_p0 = scmp.ne.s32.totalorder %s4053_s22, %s3420_s26  ;;  %p3427_p8 = scmp.lt.u32.totalorder %s3425_s14, %s3420_s26 }
  0xd9   : > { %p3429_p12 = scmp.lt.u32.totalorder %s3420_s26, %s4053_s22 }
  0xda   : > { %p3423_p6 = pnand %p3421_p0, %p3801_p7  ;;  %p3428_p2 = por %p3427_p8, %p3426_p4 }
  0xdc   : > { %p3424_p11 = pneg %p3423_p6  ;;  %p3430_p3 = por %p3429_p12, %p3428_p2 }
  0xde   : > { %p3431_p1 = pnand %p3430_p3, %p3424_p11 }
  0xe0   : > { %3434 = shalt.err (!%p3431_p1)
}
  0xe1   : > { %s3435_s21 = scalar_lea.vmem %s4057_s13, 1024  ;;  %s3625_s6 = smov [#allocation12]  }
  0xe2   : > { %p3436_p10 = scmp.ne.s32.totalorder %s4057_s13, %s3435_s21  ;;  %s3440_s17 = sshll.u32 %s3625_s6, 4  ;;  %s3441_s17 = int_to_ptr.vmem [resolvable:$false] %s3440_s17 }
  0xe3   : > { %s3442_s2 = scalar_lea.vmem %s3441_s17, 2048  ;;  %p3443_p0 = scmp.lt.s32.totalorder %s4057_s13, %s3441_s17 }
  0xe4   : > { %p3438_p9 = pnand %p3436_p10, %p3801_p7  ;;  %p3444_p6 = scmp.lt.s32.totalorder %s3442_s2, %s3435_s21 }
  0xe6   : > { %p3439_p5 = pneg %p3438_p9  ;;  %p3445_p4 = por %p3444_p6, %p3443_p0 }
  0xe8   : > { %p3446_p8 = pnand %p3445_p4, %p3439_p5 }
  0xea   : > { %3449 = shalt.err (!%p3446_p8)
}
  0xeb   : > { %s3626_s24 = smov 64   ;;  %s3627_s25 = smov 4  }
  0xec   : > { %s4612_s15 = scalar_lea.sflag [#allocation11], %s3771_s20  ;;  %s3450_s26 = scalar_lea.hbm %s3907_s8, 4096 }
  0xed   : > { %3001 = dma.hbm_to_vmem [thread:$0]  (!%p4609_p13), %s4053_s22, 1024, %s4057_s13, %s4612_s15, %s3626_s24, %s3626_s24, %s3627_s25  }
  0xee   : > { %p3451_p11 = scmp.ne.s32.totalorder %s3907_s8, %s3450_s26  ;;  %s3455_s14 = scalar_lea.hbm %s4587_s11, 8192 }
  0xef   : > { %p3456_p3 = scmp.lt.u32.totalorder %s3907_s8, %s4587_s11  ;;  %p3457_p1 = scmp.lt.u32.totalorder %s3455_s14, %s3450_s26 }
  0xf0   : > { %p3453_p2 = pnand %p3451_p11, %p3801_p7  ;;  %p3459_p9 = scmp.lt.u32.totalorder %s3450_s26, %s3907_s8 }
  0xf1   : > { %p3458_p10 = por %p3457_p1, %p3456_p3 }
  0xf2   : > { %p3454_p12 = pneg %p3453_p2 }
  0xf3   : > { %p3460_p5 = por %p3459_p9, %p3458_p10 }
  0xf5   : > { %p3461_p0 = pnand %p3460_p5, %p3454_p12 }
  0xf7   : > { %3464 = shalt.err (!%p3461_p0)
}
  0xf8   : > { %s3465_s22 = scalar_lea.vmem %s3911_s1, 4096  ;;  %s3628_s13 = smov [#allocation15]  }
  0xf9   : > { %p3466_p6 = scmp.ne.s32.totalorder %s3911_s1, %s3465_s22  ;;  %s3470_s21 = sshll.u32 %s3628_s13, 4  ;;  %s3471_s21 = int_to_ptr.vmem [resolvable:$false] %s3470_s21 }
  0xfa   : > { %s3472_s6 = scalar_lea.vmem %s3471_s21, 8192  ;;  %p3473_p11 = scmp.lt.s32.totalorder %s3911_s1, %s3471_s21 }
  0xfb   : > { %p3468_p4 = pnand %p3466_p6, %p3801_p7  ;;  %p3474_p2 = scmp.lt.s32.totalorder %s3472_s6, %s3465_s22 }
  0xfd   : > { %p3469_p8 = pneg %p3468_p4  ;;  %p3475_p3 = por %p3474_p2, %p3473_p11 }
  0xff   : > { %p3476_p1 = pnand %p3475_p3, %p3469_p8 }
 0x101   : > { %3479 = shalt.err (!%p3476_p1)
}
 0x102   : > { %s4613_s17 = scalar_lea.sflag [#allocation14], %s3771_s20  ;;  %s4614_s7 = sld [smem:[#allocation32_spill]] }
 0x103   : > { %3007 = dma.hbm_to_vmem [thread:$0]  (!%p4609_p13), %s3907_s8, 4096, %s3911_s1, %s4613_s17, %s3626_s24, %s3626_s24, %s3627_s25  }
 0x108   : > { %p4615_p7 = scmp.ne.s32.totalorder %s4614_s7, 0 }
 0x109   : > { %s4616_s2 = sld [smem:[#allocation36_spill]] (!%p4615_p7)  ;;  %s4114_s15 = sand.u32 (!%p4615_p7), 1, %s3590_s29  }
 0x10a   : > { %608 = sbr.rel (%p4615_p7) target bundleno = 3305 (0xce9), region = 72  ;;  %s4545_s26 = sshll.u32 (!%p4615_p7), %s4114_s15, 3 }
 0x10b   : > { %s611_s12 = scalar_lea.sflag (!%p4615_p7), [#allocation5], %s4114_s15  ;;  %s4120_s23 = scalar_lea.vmem (!%p4615_p7), [#allocation4], %s4545_s26 }
 0x10f   : > { %p4617_p12 = scmp.ne.s32.totalorder (!%p4615_p7), %s4616_s2, 0 }
 0x111   : > { %3553 = dma.done.wait (%p4617_p12), %s611_s12, 128  }
 0x112   : > { %3555 = vsyncadd (%p4617_p12), %s611_s12, 4294967168  ;;  %s4618_s20 = sld [smem:[#allocation33_spill]]  ;;  %s4619_s8 = sld [smem:[#allocation22_spill]] }
 0x113   : > { %s4620_s1 = sld [smem:[#allocation37_spill]] }
 0x118   : > { %s619_s24 = sand.u32 1, %s4618_s20   ;;  %s4128_s25 = sand.u32 1, %s4619_s8  }
 0x119   : > { %s620_s4 = scalar_lea.sflag [#allocation8], %s619_s24  ;;  %p4621_p13 = scmp.ne.s32.totalorder %s4620_s1, 0 }
 0x11b   : > { %3557 = dma.done.wait (%p4621_p13), %s620_s4, 32  }
 0x11c   : > { %3559 = vsyncadd (%p4621_p13), %s620_s4, 4294967264  ;;  %s2968_s3 = smul.u32 192, %s4128_s25  ;;  %s636_s22 = scalar_lea.sflag [#allocation11], %s619_s24 }
 0x11e   : > { %s4137_s13 = scalar_lea.vmem [#allocation10], %s2968_s3 }
 0x11f   : > { %3561 = dma.done.wait (%p4621_p13), %s636_s22, 4096  }
 0x120   : > { %3563 = vsyncadd (%p4621_p13), %s636_s22, 4294963200  ;;  %s2672_s21 = sshll.u32 %s4128_s25, 6  ;;  %s2673_s6 = sshll.u32 %s4128_s25, 8 }
 0x121   : > { %s4145_s17 = scalar_lea.vmem [#allocation12], %s2672_s21  ;;  %s654_s7 = scalar_lea.sflag [#allocation14], %s619_s24 }
 0x122   : > { %s4147_s2 = scalar_lea.vmem [#allocation13], %s2673_s6 }
 0x123   : > { %3565 = dma.done.wait (%p4621_p13), %s654_s7, 8192  }
 0x124   : > { %3567 = vsyncadd (%p4621_p13), %s654_s7, 4294959104  ;;  %s4622_s12 = sld [smem:[#allocation27_spill]]  ;;  %s4623_s3 = sld [smem:[#allocation48_spill]] }
 0x125   : > { %s4624_s7 = sld [smem:[#allocation49_spill]]  ;;  %s4625_s0 = sld [smem:[#allocation50_spill]] }
 0x126   : > { %s4626_s30 = sld [smem:[#allocation46_spill]]  ;;  %s4627_s28 = sld [smem:[#allocation52_spill]] }
 0x127   : > { %s4185_s1 = scalar_lea.vmem [#allocation15], %s2673_s6 }
 0x12a   : > { %p757_p10 = scmp.lt.s32.totalorder %s4622_s12, 1  ;;  %p2677_p9 = scmp.ne.s32.totalorder %s4622_s12, 0 }
 0x12b   : > { %v782_v0 = vld [vmem:[%s4120_s23] sm:$0xff] (!%p2677_p9) }
 0x12c   : > { %s4155_s20 = scalar_select %p757_p10, %s4622_s12, 1 }
 0x12d   : > { %783 = vst [vmem:[#allocation2] sm:$0xff] (!%p2677_p9), %v782_v0 }
 0x12e   : > { %s2969_s8 = smul.u32 3, %s4155_s20  ;;  %s763_s22 = scalar_lea.vmem %s4623_s3, %s4155_s20 }
 0x12f   : > { %s766_s19 = scalar_lea.vmem %s4624_s7, %s4155_s20  ;;  %s769_s10 = scalar_lea.vmem %s4625_s0, %s4155_s20 }
 0x130   : > { %s4173_s29 = scalar_lea.vmem %s4626_s30, %s2969_s8  ;;  %s2676_s9 = sshll.u32 %s4155_s20, 2 }
 0x131   : > { %s4179_s18 = scalar_lea.vmem %s4627_s28, %s2676_s9  ;;  %s4628_s3 = sld [smem:[#allocation54_spill]] }
 0x132   : > { %s4629_s7 = sshll.u32 %s4114_s15, 3  ;;  %781 = sbr.rel (%p2677_p9) target bundleno = 313 (0x139), region = 104 }
 0x133   : > { %s4189_s26 = scalar_lea.vmem [#allocation16], %s4629_s7 }
 0x137   : > { %s776_s21 = scalar_lea.vmem %s4628_s3, %s4155_s20 }
 0x139 PF: > { %v4193_v1 = vld [vmem:[#allocation2] sm:$0xff]  ;;  %v3114_v2 = vld [vmem:[%s4137_s13 + $0x4] ss:$12 sps:$4 sm:$0xff]   ;;  %v3629_v4 = vmov 0.0   ;;  %v3117_v5 = vld [vmem:[%s4137_s13 + $0x8] ss:$12 sps:$4 sm:$0xff]   ;;  %v785_v42 = vlaneseq }
 0x13a   : > { %793 = vadd.xlane.f32.xlu0 %v4193_v1  ;;  %v3116_v3 = vld [vmem:[%s4137_s13] ss:$12 sps:$4 sm:$0xff]   ;;  %2878 = vmatprep.subr.bf16.mxu1 %v3629_v4  ;;  %v3118_v6 = vld [vmem:[%s4137_s13 + $0x1c] ss:$12 sps:$4 sm:$0xff]   ;;  %v3120_v7 = vld [vmem:[%s4137_s13 + $0x18] ss:$12 sps:$4 sm:$0xff]  }
 0x13b   : > { %997 = vmatprep.subr.bf16.mxu0 %v3114_v2  ;;  %v3121_v8 = vld [vmem:[%s4137_s13 + $0x20] ss:$12 sps:$4 sm:$0xff]   ;;  %2879 = vmatpush3.bf16.msra.mxu1 %v3117_v5  ;;  %v3124_v14 = vld [vmem:[%s4137_s13 + $0x30] ss:$12 sps:$4 sm:$0xff]   ;;  %v3125_v15 = vld [vmem:[%s4137_s13 + $0x38] ss:$12 sps:$4 sm:$0xff]  }
 0x13c   : > { %v3122_v9 = vld [vmem:[%s4137_s13 + $0x34] ss:$12 sps:$4 sm:$0xff]   ;;  %998 = vmatpush1.bf16.msra.mxu0 %v3116_v3  ;;  %2880 = vmatprep.subr.bf16.mxu1 %v3629_v4  ;;  %v3126_v16 = vld [vmem:[%s4137_s13 + $0x4c] ss:$12 sps:$4 sm:$0xff]   ;;  %v3129_v18 = vld [vmem:[%s4137_s13 + $0x50] ss:$12 sps:$4 sm:$0xff]  }
 0x13d   : > { %999 = vmatprep.subr.bf16.mxu0 %v3118_v6  ;;  %v3128_v17 = vld [vmem:[%s4137_s13 + $0x48] ss:$12 sps:$4 sm:$0xff]   ;;  %v3130_v19 = vld [vmem:[%s4137_s13 + $0x64] ss:$12 sps:$4 sm:$0xff]   ;;  %v3132_v20 = vld [vmem:[%s4137_s13 + $0x60] ss:$12 sps:$4 sm:$0xff]  }
 0x13e   : > { %v3133_v21 = vld [vmem:[%s4137_s13 + $0x68] ss:$12 sps:$4 sm:$0xff]   ;;  %v3136_v23 = vld [vmem:[%s4137_s13 + $0x78] ss:$12 sps:$4 sm:$0xff]   ;;  %v3137_v24 = vld [vmem:[%s4137_s13 + $0x80] ss:$12 sps:$4 sm:$0xff]  }
 0x13f   : > { %2881 = vmatpush3.bf16.msra.mxu1 %v3121_v8  ;;  %v3134_v22 = vld [vmem:[%s4137_s13 + $0x7c] ss:$12 sps:$4 sm:$0xff]   ;;  %v3138_v25 = vld [vmem:[%s4137_s13 + $0x94] ss:$12 sps:$4 sm:$0xff]   ;;  %v3630_v26 = vmov 0   ;;  %vm3631_vm0 = vmmov 0  }
 0x140   : > { %1000 = vmatpush1.bf16.msra.mxu0 %v3120_v7  ;;  %2882 = vmatprep.subr.bf16.mxu1 %v3629_v4  ;;  %v3140_v27 = vld [vmem:[%s4137_s13 + $0x90] ss:$12 sps:$4 sm:$0xff]   ;;  %v3141_v28 = vld [vmem:[%s4137_s13 + $0x98] ss:$12 sps:$4 sm:$0xff]   ;;  %v3144_v30 = vld [vmem:[%s4137_s13 + $0xa8] ss:$12 sps:$4 sm:$0xff]  }
 0x141   : > { %1001 = vmatprep.subr.bf16.mxu0 %v3122_v9  ;;  %1029 = vmatprep.mubr.bf16.mxu0 %v3630_v26  ;;  %v3142_v29 = vld [vmem:[%s4137_s13 + $0xac] ss:$12 sps:$4 sm:$0xff]   ;;  %v3145_v31 = vld [vmem:[%s4137_s13 + $0xb0] ss:$12 sps:$4 sm:$0xff]   ;;  %s4630_s0 = scalar_lea.vmem [#allocation7], %s4128_s25  ;;  %s4631_s9 = scalar_lea.vmem [#allocation9], %s4128_s25 }
 0x142   : > { %2894 = vmatprep.mubr.msk.bf16.mxu1 %vm3631_vm0, %v3629_v4  ;;  %v2678_v36 = vld [vmem:[%s4630_s0] ss:$0 sm:$0xff]  ;;  %v4242_v43 = vshrl.u32 %v785_v42, 7  ;;  %vm1081_vm1 = vcmask 261120   ;;  %s3632_s11 = smov 96   ;;  %s3633_s27 = smov 32  }
 0x143   : > { %2883 = vmatpush3.bf16.msra.mxu1 %v3125_v15  ;;  %v2679_v38 = vld [vmem:[%s4631_s9] ss:$0 sm:$0xff]  ;;  %vm1146_vm2 = vcmask 1043456   ;;  %v788_v5 = vand.u32 127, %v785_v42  ;;  %vm1130_vm4 = vcmask 64512   ;;  %s3634_s28 = smov 64  }
 0x144   : > { %1002 = vmatpush1.bf16.msra.mxu0 %v3124_v14  ;;  %2884 = vmatprep.subr.bf16.mxu1 %v3629_v4  ;;  %v860_v44 = vsub.s32 1, %v4242_v43  ;;  %v852_v45 = vld [vmem:[%s4173_s29] sm:$0x7]  ;;  %v864_v46 = vsub.s32 2, %v4242_v43  ;;  %v856_v48 = vsub.s32 0, %v4242_v43  ;;  %vm1310_vm5 = vcmask 523520  }
 0x145   : > { %1003 = vmatprep.subr.bf16.mxu0 %v3126_v16  ;;  %vm789_vm3 = vcmp.gt.s32.totalorder %v788_v5, %v4242_v43  ;;  %vm1428_vm6 = vcmask 785920   ;;  %vm1546_vm7 = vcmask 1048320  }
 0x146   : > { %v861_v47 = vrot.slane %v852_v45, %v860_v44  ;;  %v865_v53 = vrot.slane %v852_v45, %v864_v46  ;;  %v857_v59 = vrot.slane %v852_v45, %v856_v48  ;;  %v4268_v7 = vsel %vm789_vm3, -1e+30, %v3629_v4 }
 0x147   : > { %2885 = vmatpush3.bf16.msra.mxu1 %v3129_v18 }
 0x148   : > { %1004 = vmatpush1.bf16.msra.mxu0 %v3128_v17  ;;  %2886 = vmatprep.subr.bf16.mxu1 %v3629_v4 }
 0x149   : > { %1005 = vmatprep.subr.bf16.mxu0 %v3130_v19 }
 0x14b   : > { %2887 = vmatpush3.bf16.msra.mxu1 %v3133_v21 }
 0x14c   : > { %1006 = vmatpush1.bf16.msra.mxu0 %v3132_v20  ;;  %2888 = vmatprep.subr.bf16.mxu1 %v3629_v4 }
 0x14d   : > { %1007 = vmatprep.subr.bf16.mxu0 %v3134_v22 }
 0x14f   : > { %2889 = vmatpush3.bf16.msra.mxu1 %v3137_v24 }
 0x150   : > { %1008 = vmatpush1.bf16.msra.mxu0 %v3136_v23  ;;  %2890 = vmatprep.subr.bf16.mxu1 %v3629_v4 }
 0x151   : > { %1009 = vmatprep.subr.bf16.mxu0 %v3138_v25 }
 0x153   : > { %2891 = vmatpush3.bf16.msra.mxu1 %v3141_v28 }
 0x154   : > { %1010 = vmatpush1.bf16.msra.mxu0 %v3140_v27  ;;  %2892 = vmatprep.subr.bf16.mxu1 %v3629_v4 }
 0x155   : > { %1011 = vmatprep.subr.bf16.mxu0 %v3142_v29 }
 0x157   : > { %2893 = vmatpush3.bf16.msra.mxu1 %v3145_v31 }
 0x158   : > { %1012 = vmatpush1.bf16.msra.mxu0 %v3144_v30  ;;  %2898 = vmatprep.subr.bf16.mxu1 %v3629_v4 }
 0x159   : > { %2922 = vmatprep.subr.bf16.mxu0 %v3629_v4 }
 0x1c7   : > { %v794_v10 = vpop.xlane.xlu0 %793 }
 0x1c8   : > { %v796_v11 = vmul.f32 0.0078125, %v794_v10 }
 0x1ca   : > { %v797_v12 = vsub.f32 %v4193_v1, %v796_v11 }
 0x1cc   : > { %v798_v13 = vmul.f32 %v797_v12, %v797_v12 }
 0x1ce   : > { %799 = vadd.xlane.f32.xlu0 %v798_v13 }
 0x25b   : > { %v800_v32 = vpop.xlane.xlu0 %799 }
 0x25c   : > { %v801_v33 = vmul.f32 0.0078125, %v800_v32 }
 0x25e   : > { %v802_v34 = vadd.f32 1e-05, %v801_v33 }
 0x260   : > { %3234 = vrsqrt.f32 %v802_v34 }
 0x26a   : > { %v3235_v35 = vpop.eup %3234 }
 0x26b   : > { %v804_v37 = vmul.f32 %v3235_v35, %v797_v12 }
 0x26d   : > { %v811_v39 = vmul.f32 %v2678_v36, %v804_v37 }
 0x26f   : > { %v818_v40 = vadd.f32 %v2679_v38, %v811_v39 }
 0x271   : > { %v819_v41 = vpack.c.bf16 %v818_v40, %v818_v40 }
 0x273   : > { %1030 = vmatmul.mubr.bf16.vlgmr.msra.gmra.mrb[0].mxu0 %v819_v41  ;;  %2895 = vmatmul.mubr.bf16.vlgmr.msra.gmra.mrb[0].mxu1 %v819_v41 }
 0x274   : > { %2900 = vmatprep.mubr.msk.bf16.mxu1 %vm3631_vm0, %v3629_v4  ;;  %2924 = vmatprep.mubr.msk.bf16.mxu0 %vm3631_vm0, %v3629_v4 }
 0x346   : > { %v1031_v49 = vpop.f32.mrb[0].mxu0  ;;  %v1072_v50 = vpop.f32.mrb[0].mxu1 }
 0x347   : > { %v1033_v51 = vpop.f32.mrb[1].mxu0  ;;  %v2896_v52 = vpop.f32.mrb[1].mxu1  ;;  %v1073_v61 = vadd.f32 %v1072_v50, %v865_v53  ;;  %v1032_v63 = vadd.f32 %v1031_v49, %v857_v59 }
 0x348   : > { %v1034_v54 = vadd.f32 %v1033_v51, %v861_v47  ;;  %v1035_v55 = vpop.f32.mrb[2].mxu0  ;;  %v1075_v56 = vpop.f32.mrb[2].mxu1 }
 0x349   : > { %v1036_v57 = vpop.f32.mrb[3].mxu0  ;;  %v2897_v58 = vpop.f32.mrb[3].mxu1  ;;  %v4257_v0 = vpack.c.bf16 %v1073_v61, %v1073_v61  ;;  %v1078_v2 = vpack.c.bf16 %v1032_v63, %v1032_v63 }
 0x34a   : > { %v1079_v60 = vpack.c.bf16 %v1034_v54, %v1034_v54 }
 0x34b   : > { %v1148_v3 = vsel %vm1146_vm2, %v4257_v0, 0 }
 0x34c   : > { %1195 = vrot.lane.b32.xlu0 %v1079_v60, %s3632_s11  ;;  %v1086_v62 = vsel %vm1081_vm1, %v1079_v60, 0 }
 0x34d   : > { %2899 = vmatpush3.bf16.xpose.msra.mxu1 %v1086_v62 }
 0x34e   : > { %2904 = vmatprep.subr.bf16.mxu1 %v3629_v4 }
 0x350   : > { %1432 = vrot.lane.b32.xlu0 %v1079_v60, %s3633_s27 }
 0x354   : > { %2901 = vmatmul.mubr.msk.bf16.vlgmr.msra.gmra.mrb[4].mxu1 %vm1081_vm1, %v1078_v2 }
 0x355   : > { %2905 = vmatpush3.bf16.msra.mxu1 %v1148_v3  ;;  %2906 = vmatprep.mubr.msk.bf16.mxu1 %vm3631_vm0, %v3629_v4 }
 0x356   : > { %2910 = vmatprep.subr.bf16.mxu1 %v3629_v4 }
 0x3be   : > { %v1196_v21 = vpop.permute.xlu0 %1195 }
 0x3bf   : > { %v1201_v29 = vsel %vm1081_vm1, %v1196_v21, 0 }
 0x3c2   : > { %v1433_v27 = vpop.permute.xlu0 %1432 }
 0x3c3   : > { %v1438_v31 = vsel %vm1081_vm1, %v1433_v27, 0 }
 0x427   : > { %v1122_v6 = vpop.f32.mrb[4].mxu1 }
 0x428   : > { %v1128_v8 = vmul.f32 0.17677669, %v1122_v6  ;;  %v2902_v9 = vpop.f32.mrb[5].mxu1 }
 0x429   : > { %v1125_v10 = vpop.f32.mrb[6].mxu1 }
 0x42a   : > { %v2903_v11 = vpop.f32.mrb[7].mxu1  ;;  %v1129_v12 = vadd.f32 %v1128_v8, %v4268_v7 }
 0x42c   : > { %v1131_v13 = vsel %vm1130_vm4, %v1129_v12, -inf }
 0x42d   : > { %1132 = vmax.xlane.f32.xlu1 %v1131_v13 }
 0x4ba   : > { %v1133_v14 = vpop.xlane.xlu1 %1132 }
 0x4bb   : > { %v1134_v15 = vsub.f32 %v1129_v12, %v1133_v14 }
 0x4bd   : > { %v1135_v16 = vmul.f32 1.442695, %v1134_v15 }
 0x4bf   : > { %3236 = vpow2.f32 %v1135_v16 }
 0x4c9   : > { %v3237_v17 = vpop.eup %3236 }
 0x4ca   : > { %v1137_v18 = vsel %vm1130_vm4, %v3237_v17, 0.0 }
 0x4cb   : > { %1138 = vadd.xlane.f32.xlu1 %v1137_v18 }
 0x4dc   : > { %1192 = vrot.lane.b32.xlu1 %v1078_v2, %s3632_s11 }
 0x4e0   : > { %1314 = vrot.lane.b32.xlu1 %v1079_v60, %s3634_s28 }
 0x4e4   : > { %1312 = vrot.lane.b32.xlu1 %v1078_v2, %s3634_s28 }
 0x4e8   : > { %1430 = vrot.lane.b32.xlu1 %v1078_v2, %s3633_s27 }
 0x558   : > { %v1139_v19 = vpop.xlane.xlu1 %1138 }
 0x559   : > { %3238 = vrcp.f32 %v1139_v19 }
 0x55c   : > { %v1193_v20 = vpop.permute.xlu1 %1192 }
 0x560   : > { %v1315_v22 = vpop.permute.xlu1 %1314 }
 0x561   : > { %v1320_v23 = vsel %vm1081_vm1, %v1315_v22, 0 }
 0x562   : > { %2923 = vmatpush3.bf16.xpose.msra.mxu0 %v1320_v23 }
 0x563   : > { %v3239_v24 = vpop.eup %3238  ;;  %2934 = vmatprep.subr.bf16.mxu0 %v3629_v4 }
 0x564   : > { %v1141_v25 = vmul.f32 %v3239_v24, %v3237_v17  ;;  %v1313_v30 = vpop.permute.xlu1 %1312 }
 0x566   : > { %v1142_v28 = vpack.c.bf16 %v1141_v25, %v1141_v25 }
 0x568   : > { %2907 = vmatmul.mubr.msk.bf16.vlgmr.msra.gmra.mrb[8].mxu1 %vm1130_vm4, %v1142_v28  ;;  %v1431_v32 = vpop.permute.xlu1 %1430 }
 0x569   : > { %2911 = vmatpush3.bf16.xpose.msra.mxu1 %v1201_v29  ;;  %2925 = vmatmul.mubr.msk.bf16.vlgmr.msra.gmra.mrb[4].mxu0 %vm1081_vm1, %v1313_v30 }
 0x56a   : > { %2935 = vmatpush3.bf16.xpose.msra.mxu0 %v1438_v31  ;;  %2912 = vmatprep.mubr.msk.bf16.mxu1 %vm3631_vm0, %v3629_v4 }
 0x56b   : > { %2936 = vmatprep.mubr.msk.bf16.mxu0 %vm3631_vm0, %v3629_v4  ;;  %2916 = vmatprep.subr.bf16.mxu1 %v3629_v4 }
 0x56c   : > { %2946 = vmatprep.subr.bf16.mxu0 %v3629_v4 }
 0x570   : > { %2913 = vmatmul.mubr.msk.bf16.vlgmr.msra.gmra.mrb[12].mxu1 %vm1081_vm1, %v1193_v20 }
 0x571   : > { %2937 = vmatmul.mubr.msk.bf16.vlgmr.msra.gmra.mrb[8].mxu0 %vm1081_vm1, %v1431_v32  ;;  %2918 = vmatprep.mubr.msk.bf16.mxu1 %vm3631_vm0, %v3629_v4 }
 0x572   : > { %2962 = vmatprep.mubr.msk.bf16.mxu0 %vm3631_vm0, %v3629_v4 }
 0x63b   : > { %v1184_v33 = vpop.f32.mrb[8].mxu1 }
 0x63c   : > { %1190 = vst.msk [vmem:[#allocation3] sm:$0xff] %vm1081_vm1, %v1184_v33  ;;  %v2908_v34 = vpop.f32.mrb[9].mxu1  ;;  %v1356_v35 = vpop.f32.mrb[4].mxu0 }
 0x63d   : > { %v1362_v36 = vmul.f32 0.17677669, %v1356_v35  ;;  %v1187_v37 = vpop.f32.mrb[10].mxu1  ;;  %v2926_v38 = vpop.f32.mrb[5].mxu0  ;;  %v3146_v34 = vld [vmem:[%s4145_s17] sm:$0xff]   ;;  %v3147_v35 = vld [vmem:[%s4145_s17 + $0x8] sm:$0xff]  }
 0x63e   : > { %v2909_v39 = vpop.f32.mrb[11].mxu1  ;;  %v1359_v40 = vpop.f32.mrb[6].mxu0  ;;  %2947 = vmatpush3.bf16.msra.mxu0 %v3146_v34  ;;  %v3149_v37 = vld [vmem:[%s4145_s17 + $0x18] sm:$0xff]   ;;  %v3150_v38 = vld [vmem:[%s4145_s17 + $0x20] sm:$0xff]  }
 0x63f   : > { %v2927_v41 = vpop.f32.mrb[7].mxu0  ;;  %v1363_v42 = vadd.f32 %v1362_v36, %v4268_v7  ;;  %2948 = vmatprep.subr.bf16.mxu0 %v3629_v4  ;;  %v3148_v36 = vld [vmem:[%s4145_s17 + $0x10] sm:$0xff]   ;;  %v3151_v39 = vld [vmem:[%s4145_s17 + $0x28] sm:$0xff]  }
 0x640   : > { %v3192_v34 = vld [vmem:[%s4147_s2 + $0xc4] ss:$16 sps:$4 sm:$0xff]  }
 0x641   : > { %v1364_v45 = vsel %vm1130_vm4, %v1363_v42, -inf }
 0x642   : > { %1365 = vmax.xlane.f32.xlu1 %v1364_v45  ;;  %2949 = vmatpush3.bf16.msra.mxu0 %v3147_v35  ;;  %v3195_v35 = vld [vmem:[%s4147_s2 + $0xcc] ss:$16 sps:$4 sm:$0xff]  }
 0x643   : > { %v1237_v47 = vpop.f32.mrb[12].mxu1  ;;  %2950 = vmatprep.subr.bf16.mxu0 %v3629_v4 }
 0x644   : > { %v1243_v49 = vmul.f32 0.17677669, %v1237_v47  ;;  %v2914_v50 = vpop.f32.mrb[13].mxu1  ;;  %v1474_v51 = vpop.f32.mrb[8].mxu0  ;;  %v3152_v47 = vld [vmem:[%s4145_s17 + $0x30] sm:$0xff]  }
 0x645   : > { %v1480_v52 = vmul.f32 0.17677669, %v1474_v51  ;;  %v1240_v53 = vpop.f32.mrb[14].mxu1  ;;  %v2938_v54 = vpop.f32.mrb[9].mxu0 }
 0x646   : > { %v2915_v55 = vpop.f32.mrb[15].mxu1  ;;  %v1477_v56 = vpop.f32.mrb[10].mxu0  ;;  %v1244_v57 = vadd.f32 %v1243_v49, %v4268_v7  ;;  %2951 = vmatpush3.bf16.msra.mxu0 %v3148_v36  ;;  %v3153_v49 = vld [vmem:[%s4145_s17 + $0x38] sm:$0xff]   ;;  %v3190_v36 = vld [vmem:[%s4147_s2 + $0xc0] ss:$16 sps:$4 sm:$0xff]   ;;  %s4636_s17 = sld [smem:[#allocation27_spill]] }
 0x647   : > { %v2939_v58 = vpop.f32.mrb[11].mxu0  ;;  %v1481_v60 = vadd.f32 %v1480_v52, %v4268_v7  ;;  %2952 = vmatprep.subr.bf16.mxu0 %v3629_v4 }
 0x648   : > { %v1245_v59 = vsel %vm1130_vm4, %v1244_v57, -inf }
 0x649   : > { %1246 = vmax.xlane.f32.xlu0 %v1245_v59  ;;  %v1482_v61 = vsel %vm1130_vm4, %v1481_v60, -inf }
 0x64a   : > { %2953 = vmatpush3.bf16.msra.mxu0 %v3149_v37  ;;  %v3193_v37 = vld [vmem:[%s4147_s2 + $0xc8] ss:$16 sps:$4 sm:$0xff]  }
 0x64b   : > { %2954 = vmatprep.subr.bf16.mxu0 %v3629_v4 }
 0x64c   : > { %p2792_p5 = scmp.ne.s32.totalorder %s4636_s17, 1 }
 0x64d   : > { %1483 = vmax.xlane.f32.xlu0 %v1482_v61 }
 0x64e   : > { %2955 = vmatpush3.bf16.msra.mxu0 %v3150_v38  ;;  %v3198_v38 = vld [vmem:[%s4147_s2 + $0xe4] ss:$16 sps:$4 sm:$0xff]  }
 0x64f   : > { %2956 = vmatprep.subr.bf16.mxu0 %v3629_v4 }
 0x652   : > { %2957 = vmatpush3.bf16.msra.mxu0 %v3151_v39  ;;  %v3201_v39 = vld [vmem:[%s4147_s2 + $0xec] ss:$16 sps:$4 sm:$0xff]  }
 0x653   : > { %2958 = vmatprep.subr.bf16.mxu0 %v3629_v4 }
 0x656   : > { %2959 = vmatpush3.bf16.msra.mxu0 %v3152_v47 }
 0x657   : > { %2960 = vmatprep.subr.bf16.mxu0 %v3629_v4 }
 0x65a   : > { %2961 = vmatpush3.bf16.msra.mxu0 %v3153_v49 }
 0x6cf   : > { %v1366_v62 = vpop.xlane.xlu1 %1365 }
 0x6d0   : > { %v1367_v63 = vsub.f32 %v1363_v42, %v1366_v62 }
 0x6d2   : > { %v1368_v2 = vmul.f32 1.442695, %v1367_v63  ;;  %v2720_v63 = vld [vmem:[%s763_s22] ss:$0 sm:$0xff] }
 0x6d4   : > { %3240 = vpow2.f32 %v1368_v2 }
 0x6d6   : > { %v1247_v3 = vpop.xlane.xlu0 %1246 }
 0x6d7   : > { %v1248_v5 = vsub.f32 %v1244_v57, %v1247_v3 }
 0x6d9   : > { %v1249_v6 = vmul.f32 1.442695, %v1248_v5 }
 0x6da   : > { %v1484_v8 = vpop.xlane.xlu0 %1483 }
 0x6db   : > { %3242 = vpow2.f32 %v1249_v6  ;;  %v1485_v9 = vsub.f32 %v1481_v60, %v1484_v8 }
 0x6dd   : > { %v1486_v10 = vmul.f32 1.442695, %v1485_v9  ;;  %v3156_v9 = vld [vmem:[%s4147_s2 + $0x4] ss:$16 sps:$4 sm:$0xff]  }
 0x6de   : > { %v3241_v11 = vpop.eup %3240 }
 0x6df   : > { %3244 = vpow2.f32 %v1486_v10  ;;  %v1370_v12 = vsel %vm1130_vm4, %v3241_v11, 0.0  ;;  %v3157_v10 = vld [vmem:[%s4147_s2 + $0x8] ss:$16 sps:$4 sm:$0xff]  }
 0x6e0   : > { %1371 = vadd.xlane.f32.xlu0 %v1370_v12  ;;  %v3162_v12 = vld [vmem:[%s4147_s2 + $0x24] ss:$16 sps:$4 sm:$0xff]  }
 0x6e5   : > { %v3243_v7 = vpop.eup %3242 }
 0x6e6   : > { %v1251_v13 = vsel %vm1130_vm4, %v3243_v7, 0.0 }
 0x6e7   : > { %1252 = vadd.xlane.f32.xlu0 %v1251_v13  ;;  %v3163_v13 = vld [vmem:[%s4147_s2 + $0x28] ss:$16 sps:$4 sm:$0xff]  }
 0x6e9   : > { %v3245_v14 = vpop.eup %3244 }
 0x6ea   : > { %v1488_v15 = vsel %vm1130_vm4, %v3245_v14, 0.0 }
 0x6eb   : > { %1489 = vadd.xlane.f32.xlu1 %v1488_v15  ;;  %v3171_v15 = vld [vmem:[%s4147_s2 + $0x4c] ss:$16 sps:$4 sm:$0xff]  }
 0x6fc   : > { %1376 = vrot.lane.b32.xlu1 %v4257_v0, %s3634_s28 }
 0x6fd   : > { %1258 = vrot.lane.b32.xlu0 %v4257_v0, %s3632_s11 }
 0x700   : > { %1494 = vrot.lane.b32.xlu1 %v4257_v0, %s3633_s27 }
 0x76d   : > { %v1372_v16 = vpop.xlane.xlu0 %1371 }
 0x774   : > { %v1253_v17 = vpop.xlane.xlu0 %1252 }
 0x775   : > { %3246 = vrcp.f32 %v1253_v17  ;;  %v3169_v17 = vld [vmem:[%s4147_s2 + $0x48] ss:$16 sps:$4 sm:$0xff]  }
 0x776   : > { %3248 = vrcp.f32 %v1372_v16  ;;  %v3166_v16 = vld [vmem:[%s4147_s2 + $0x40] ss:$16 sps:$4 sm:$0xff]  }
 0x778   : > { %v1259_v18 = vpop.permute.xlu0 %1258  ;;  %v1490_v20 = vpop.xlane.xlu1 %1489 }
 0x779   : > { %v1264_v19 = vsel %vm1146_vm2, %v1259_v18, 0  ;;  %3250 = vrcp.f32 %v1490_v20 }
 0x77a   : > { %2917 = vmatpush3.bf16.msra.mxu1 %v1264_v19 }
 0x77b   : > { %2928 = vmatprep.subr.bf16.mxu1 %v3629_v4 }
 0x77c   : > { %v1377_v23 = vpop.permute.xlu1 %1376 }
 0x77d   : > { %v1382_v27 = vsel %vm1146_vm2, %v1377_v23, 0  ;;  %v3177_v23 = vld [vmem:[%s4147_s2 + $0x6c] ss:$16 sps:$4 sm:$0xff]  }
 0x77f   : > { %v3247_v21 = vpop.eup %3246 }
 0x780   : > { %v1255_v22 = vmul.f32 %v3247_v21, %v3243_v7  ;;  %v3249_v25 = vpop.eup %3248  ;;  %v1495_v28 = vpop.permute.xlu1 %1494  ;;  %v3165_v7 = vld [vmem:[%s4147_s2 + $0x2c] ss:$16 sps:$4 sm:$0xff]  }
 0x781   : > { %v1374_v0 = vmul.f32 %v3249_v25, %v3241_v11  ;;  %v1500_v31 = vsel %vm1146_vm2, %v1495_v28, 0  ;;  %v3159_v11 = vld [vmem:[%s4147_s2 + $0xc] ss:$16 sps:$4 sm:$0xff]   ;;  %v3175_v25 = vld [vmem:[%s4147_s2 + $0x68] ss:$16 sps:$4 sm:$0xff]  }
 0x782   : > { %v1256_v24 = vpack.c.bf16 %v1255_v22, %v1255_v22  ;;  %1946 = vmatprep.subr.bf16.mxu0 %v3159_v11  ;;  %v3174_v22 = vld [vmem:[%s4147_s2 + $0x64] ss:$16 sps:$4 sm:$0xff]   ;;  %v3178_v28 = vld [vmem:[%s4147_s2 + $0x80] ss:$16 sps:$4 sm:$0xff]  }
 0x783   : > { %v1375_v29 = vpack.c.bf16 %v1374_v0, %v1374_v0  ;;  %v3251_v30 = vpop.eup %3250  ;;  %v3183_v0 = vld [vmem:[%s4147_s2 + $0x8c] ss:$16 sps:$4 sm:$0xff]   ;;  %v3218_v11 = vld [vmem:[%s4185_s1 + $0x60] sm:$0xff]  }
 0x784   : > { %2919 = vmatmul.mubr.msk.bf16.vlgmr.msra.gmra.mrb[16].mxu1 %vm1130_vm4, %v1256_v24  ;;  %v1492_v32 = vmul.f32 %v3251_v30, %v3245_v14  ;;  %v3168_v14 = vld [vmem:[%s4147_s2 + $0x44] ss:$16 sps:$4 sm:$0xff]   ;;  %v3172_v24 = vld [vmem:[%s4147_s2 + $0x60] ss:$16 sps:$4 sm:$0xff]  }
 0x785   : > { %2929 = vmatpush3.bf16.msra.mxu1 %v1382_v27  ;;  %2930 = vmatprep.mubr.msk.bf16.mxu1 %vm3631_vm0, %v3629_v4  ;;  %v3180_v27 = vld [vmem:[%s4147_s2 + $0x84] ss:$16 sps:$4 sm:$0xff]  }
 0x786   : > { %2940 = vmatprep.subr.bf16.mxu1 %v3629_v4  ;;  %v1493_v33 = vpack.c.bf16 %v1492_v32, %v1492_v32  ;;  %v3186_v30 = vld [vmem:[%s4147_s2 + $0xa4] ss:$16 sps:$4 sm:$0xff]   ;;  %v3184_v32 = vld [vmem:[%s4147_s2 + $0xa0] ss:$16 sps:$4 sm:$0xff]  }
 0x78c   : > { %2931 = vmatmul.mubr.msk.bf16.vlgmr.msra.gmra.mrb[20].mxu1 %vm1130_vm4, %v1375_v29  ;;  %v3181_v29 = vld [vmem:[%s4147_s2 + $0x88] ss:$16 sps:$4 sm:$0xff]  }
 0x78d   : > { %2941 = vmatpush3.bf16.msra.mxu1 %v1500_v31  ;;  %2942 = vmatprep.mubr.msk.bf16.mxu1 %vm3631_vm0, %v3629_v4  ;;  %v3189_v31 = vld [vmem:[%s4147_s2 + $0xac] ss:$16 sps:$4 sm:$0xff]  }
 0x78e   : > { %1905 = vmatprep.subr.bf16.mxu1 %v3156_v9  ;;  %v3216_v9 = vld [vmem:[%s4185_s1 + $0x18] sm:$0xff]  }
 0x794   : > { %2943 = vmatmul.mubr.msk.bf16.vlgmr.msra.gmra.mrb[24].mxu1 %vm1130_vm4, %v1493_v33  ;;  %v3187_v33 = vld [vmem:[%s4147_s2 + $0xa8] ss:$16 sps:$4 sm:$0xff]  }
 0x795   : > { %1937 = vmatprep.mubr.bf16.mxu1 %v3630_v26 }
 0x857   : > { %v1300_v40 = vpop.f32.mrb[16].mxu1 }
 0x858   : > { %1307 = vrot.lane.b32.xlu1 %v1300_v40, %s3633_s27  ;;  %v2920_v41 = vpop.f32.mrb[17].mxu1  ;;  %v3196_v40 = vld [vmem:[%s4147_s2 + $0xe0] ss:$16 sps:$4 sm:$0xff]  }
 0x859   : > { %v1303_v42 = vpop.f32.mrb[18].mxu1  ;;  %v3199_v41 = vld [vmem:[%s4147_s2 + $0xe8] ss:$16 sps:$4 sm:$0xff]  }
 0x85a   : > { %v2921_v45 = vpop.f32.mrb[19].mxu1 }
 0x85f   : > { %v1418_v50 = vpop.f32.mrb[20].mxu1 }
 0x860   : > { %1425 = vrot.lane.b32.xlu0 %v1418_v50, %s3634_s28  ;;  %v2932_v51 = vpop.f32.mrb[21].mxu1  ;;  %v2721_v50 = vld [vmem:[%s766_s19] ss:$0 sm:$0xff] }
 0x861   : > { %v1421_v52 = vpop.f32.mrb[22].mxu1 }
 0x862   : > { %v2933_v53 = vpop.f32.mrb[23].mxu1  ;;  %v2722_v52 = vld [vmem:[%s769_s10] ss:$0 sm:$0xff] }
 0x867   : > { %v1536_v54 = vpop.f32.mrb[24].mxu1 }
 0x868   : > { %1543 = vrot.lane.b32.xlu1 %v1536_v54, %s3632_s11  ;;  %v2944_v55 = vpop.f32.mrb[25].mxu1 }
 0x869   : > { %v1539_v56 = vpop.f32.mrb[26].mxu1 }
 0x86a   : > { %v2945_v57 = vpop.f32.mrb[27].mxu1  ;;  %v3202_v56 = vld [vmem:[%s4185_s1 + $0x40] sm:$0xff]  }
 0x86b   : > { %v3203_v57 = vld [vmem:[%s4185_s1 + $0xc0] sm:$0xff]  }
 0x8ca   : > { %v1308_v58 = vpop.permute.xlu1 %1307 }
 0x8cb   : > { %1311 = vst.msk [vmem:[#allocation3] sm:$0xff] %vm1310_vm5, %v1308_v58  ;;  %v3204_v58 = vld [vmem:[%s4185_s1] sm:$0xff]  }
 0x8d2   : > { %v1426_v59 = vpop.permute.xlu0 %1425 }
 0x8d3   : > { %1429 = vst.msk [vmem:[#allocation3] sm:$0xff] %vm1428_vm6, %v1426_v59  ;;  %v3205_v59 = vld [vmem:[%s4185_s1 + $0x80] sm:$0xff]  }
 0x8da   : > { %v1544_v4 = vpop.permute.xlu1 %1543 }
 0x8db   : > { %1547 = vst.msk [vmem:[#allocation3] sm:$0xff] %vm1546_vm7, %v1544_v4  ;;  %v3206_v4 = vld [vmem:[%s4185_s1 + $0x48] sm:$0xff]  }
 0x8e2   : > { %v1548_v60 = vld [vmem:[#allocation3] sm:$0xff] }
 0x8e3   : > { %v1549_v61 = vpack.c.bf16 %v1548_v60, %v1548_v60  ;;  %v3207_v60 = vld [vmem:[%s4185_s1 + $0xc8] sm:$0xff]  }
 0x8e5   : > { %2963 = vmatmul.mubr.bf16.vlgmr.msra.gmra.mrb[12].mxu0 %v1549_v61  ;;  %v3208_v61 = vld [vmem:[%s4185_s1 + $0x8] sm:$0xff]  }
 0x8e6   : > { %1978 = vmatprep.mubr.bf16.mxu0 %v3630_v26  ;;  %v3154_v26 = vld [vmem:[%s4147_s2] ss:$16 sps:$4 sm:$0xff]   ;;  %1947 = vmatpush1.bf16.msra.mxu0 %v3157_v10  ;;  %v3217_v10 = vld [vmem:[%s4185_s1 + $0x98] sm:$0xff]  }
 0x8e7   : > { %1906 = vmatpush1.bf16.msra.mxu1 %v3154_v26  ;;  %1948 = vmatprep.subr.bf16.mxu0 %v3165_v7  ;;  %v3215_v26 = vld [vmem:[%s4185_s1 + $0xd8] sm:$0xff]   ;;  %v3220_v7 = vld [vmem:[%s4185_s1 + $0x20] sm:$0xff]  }
 0x8e8   : > { %1907 = vmatprep.subr.bf16.mxu1 %v3162_v12  ;;  %v3219_v12 = vld [vmem:[%s4185_s1 + $0xe0] sm:$0xff]  }
 0x8ea   : > { %1949 = vmatpush1.bf16.msra.mxu0 %v3163_v13  ;;  %v3222_v13 = vld [vmem:[%s4185_s1 + $0x68] sm:$0xff]  }
 0x8eb   : > { %1950 = vmatprep.subr.bf16.mxu0 %v3171_v15  ;;  %v3224_v15 = vld [vmem:[%s4185_s1 + $0x28] sm:$0xff]  }
 0x8ee   : > { %1951 = vmatpush1.bf16.msra.mxu0 %v3169_v17  ;;  %v3226_v17 = vld [vmem:[%s4185_s1 + $0x70] sm:$0xff]  }
 0x8ef   : > { %1952 = vmatprep.subr.bf16.mxu0 %v3177_v23  ;;  %v3232_v23 = vld [vmem:[%s4185_s1 + $0x38] sm:$0xff]  }
 0x8f2   : > { %1953 = vmatpush1.bf16.msra.mxu0 %v3175_v25  ;;  %v1723_v25 = vld [vmem:[%s4179_s18] sm:$0xf] }
 0x8f3   : > { %1954 = vmatprep.subr.bf16.mxu0 %v3183_v0  ;;  %v1728_v0 = vrot.slane %v1723_v25, %v856_v48 }
 0x8f6   : > { %1955 = vmatpush1.bf16.msra.mxu0 %v3181_v29  ;;  %v1732_v29 = vrot.slane %v1723_v25, %v860_v44 }
 0x8f7   : > { %1956 = vmatprep.subr.bf16.mxu0 %v3189_v31 }
 0x8fa   : > { %1957 = vmatpush1.bf16.msra.mxu0 %v3187_v33 }
 0x8fb   : > { %1958 = vmatprep.subr.bf16.mxu0 %v3195_v35 }
 0x8fe   : > { %1959 = vmatpush1.bf16.msra.mxu0 %v3193_v37 }
 0x8ff   : > { %1960 = vmatprep.subr.bf16.mxu0 %v3201_v39 }
 0x902   : > { %1961 = vmatpush1.bf16.msra.mxu0 %v3199_v41 }
 0x903   : > { %2856 = vmatprep.subr.bf16.mxu0 %v3203_v57 }
 0x9b8   : > { %v1648_v62 = vpop.f32.mrb[12].mxu0 }
 0x9b9   : > { %v1654_v2 = vadd.f32 %v1648_v62, %v4193_v1  ;;  %v2964_v3 = vpop.f32.mrb[13].mxu0  ;;  %v3160_v1 = vld [vmem:[%s4147_s2 + $0x20] ss:$16 sps:$4 sm:$0xff]   ;;  %v3209_v62 = vld [vmem:[%s4185_s1 + $0x88] sm:$0xff]  }
 0x9ba   : > { %v1651_v5 = vpop.f32.mrb[14].mxu0  ;;  %1908 = vmatpush1.bf16.msra.mxu1 %v3160_v1  ;;  %v3212_v3 = vld [vmem:[%s4185_s1 + $0x10] sm:$0xff]   ;;  %v3221_v1 = vld [vmem:[%s4185_s1 + $0xa0] sm:$0xff]  }
 0x9bb   : > { %v4349_v6 = vadd.f32 %v2720_v63, %v1654_v2  ;;  %v2965_v8 = vpop.f32.mrb[15].mxu0  ;;  %1909 = vmatprep.subr.bf16.mxu1 %v3168_v14  ;;  %v3210_v63 = vld [vmem:[%s4185_s1 + $0x50] sm:$0xff]   ;;  %v3223_v14 = vld [vmem:[%s4185_s1 + $0xe8] sm:$0xff]  }
 0x9bc   : > { %v3211_v2 = vld [vmem:[%s4185_s1 + $0xd0] sm:$0xff]   ;;  %v3214_v8 = vld [vmem:[%s4185_s1 + $0x58] sm:$0xff]  }
 0x9bd   : > { %1665 = vadd.xlane.f32.xlu0 %v4349_v6  ;;  %v3213_v5 = vld [vmem:[%s4185_s1 + $0x90] sm:$0xff]  }
 0x9be   : > { %1910 = vmatpush1.bf16.msra.mxu1 %v3166_v16  ;;  %v3225_v16 = vld [vmem:[%s4185_s1 + $0xa8] sm:$0xff]  }
 0x9bf   : > { %1911 = vmatprep.subr.bf16.mxu1 %v3174_v22  ;;  %v3231_v22 = vld [vmem:[%s4185_s1 + $0xf8] sm:$0xff]  }
 0x9c2   : > { %1912 = vmatpush1.bf16.msra.mxu1 %v3172_v24  ;;  %v3233_v24 = vld [vmem:[%s4185_s1 + $0xb8] sm:$0xff]  }
 0x9c3   : > { %1913 = vmatprep.subr.bf16.mxu1 %v3180_v27  ;;  %v1739_v27 = vsub.s32 3, %v4242_v43 }
 0x9c6   : > { %1914 = vmatpush1.bf16.msra.mxu1 %v3178_v28  ;;  %v1736_v28 = vrot.slane %v1723_v25, %v864_v46 }
 0x9c7   : > { %1915 = vmatprep.subr.bf16.mxu1 %v3186_v30  ;;  %v1740_v30 = vrot.slane %v1723_v25, %v1739_v27 }
 0x9ca   : > { %1916 = vmatpush1.bf16.msra.mxu1 %v3184_v32 }
 0x9cb   : > { %1917 = vmatprep.subr.bf16.mxu1 %v3192_v34 }
 0x9ce   : > { %1918 = vmatpush1.bf16.msra.mxu1 %v3190_v36 }
 0x9cf   : > { %1919 = vmatprep.subr.bf16.mxu1 %v3198_v38 }
 0x9d2   : > { %1920 = vmatpush1.bf16.msra.mxu1 %v3196_v40 }
 0x9d3   : > { %2834 = vmatprep.subr.bf16.mxu1 %v3202_v56 }
 0xa4a   : > { %v1666_v18 = vpop.xlane.xlu0 %1665 }
 0xa4b   : > { %v1667_v19 = vmul.f32 0.0078125, %v1666_v18  ;;  %v3227_v18 = vld [vmem:[%s4185_s1 + $0xf0] sm:$0xff]  }
 0xa4d   : > { %v1668_v20 = vsub.f32 %v4349_v6, %v1667_v19  ;;  %v3228_v19 = vld [vmem:[%s4185_s1 + $0x30] sm:$0xff]  }
 0xa4f   : > { %v1669_v21 = vmul.f32 %v1668_v20, %v1668_v20 }
 0xa51   : > { %1670 = vadd.xlane.f32.xlu1 %v1669_v21  ;;  %v3230_v21 = vld [vmem:[%s4185_s1 + $0x78] sm:$0xff]  }
 0xade   : > { %v1671_v42 = vpop.xlane.xlu1 %1670 }
 0xadf   : > { %v1672_v45 = vmul.f32 0.0078125, %v1671_v42 }
 0xae1   : > { %v1673_v47 = vadd.f32 1e-05, %v1672_v45 }
 0xae3   : > { %3252 = vrsqrt.f32 %v1673_v47 }
 0xaed   : > { %v3253_v49 = vpop.eup %3252 }
 0xaee   : > { %v1675_v51 = vmul.f32 %v3253_v49, %v1668_v20  ;;  %v3229_v20 = vld [vmem:[%s4185_s1 + $0xb0] sm:$0xff]  }
 0xaf0   : > { %v1682_v53 = vmul.f32 %v2721_v50, %v1675_v51 }
 0xaf2   : > { %v1689_v54 = vadd.f32 %v2722_v52, %v1682_v53 }
 0xaf4   : > { %v1690_v55 = vpack.c.bf16 %v1689_v54, %v1689_v54 }
 0xaf6   : > { %1938 = vmatmul.mubr.bf16.vlgmr.msra.gmra.mrb[28].mxu1 %v1690_v55  ;;  %1979 = vmatmul.mubr.bf16.vlgmr.msra.gmra.mrb[16].mxu0 %v1690_v55 }
 0xaf7   : > { %2835 = vmatpush3.bf16.msra.mxu1 %v3204_v58  ;;  %2857 = vmatpush3.bf16.msra.mxu0 %v3205_v59 }
 0xaf8   : > { %2836 = vmatprep.subr.bf16.mxu1 %v3206_v4  ;;  %2858 = vmatprep.subr.bf16.mxu0 %v3207_v60 }
 0xafb   : > { %2837 = vmatpush3.bf16.msra.mxu1 %v3208_v61  ;;  %2859 = vmatpush3.bf16.msra.mxu0 %v3209_v62 }
 0xafc   : > { %2838 = vmatprep.subr.bf16.mxu1 %v3210_v63  ;;  %2860 = vmatprep.subr.bf16.mxu0 %v3211_v2 }
 0xaff   : > { %2839 = vmatpush3.bf16.msra.mxu1 %v3212_v3  ;;  %2861 = vmatpush3.bf16.msra.mxu0 %v3213_v5 }
 0xb00   : > { %2840 = vmatprep.subr.bf16.mxu1 %v3214_v8  ;;  %2862 = vmatprep.subr.bf16.mxu0 %v3215_v26 }
 0xb03   : > { %2841 = vmatpush3.bf16.msra.mxu1 %v3216_v9  ;;  %2863 = vmatpush3.bf16.msra.mxu0 %v3217_v10 }
 0xb04   : > { %2842 = vmatprep.subr.bf16.mxu1 %v3218_v11  ;;  %2864 = vmatprep.subr.bf16.mxu0 %v3219_v12 }
 0xb07   : > { %2843 = vmatpush3.bf16.msra.mxu1 %v3220_v7  ;;  %2865 = vmatpush3.bf16.msra.mxu0 %v3221_v1 }
 0xb08   : > { %2844 = vmatprep.subr.bf16.mxu1 %v3222_v13  ;;  %2866 = vmatprep.subr.bf16.mxu0 %v3223_v14 }
 0xb0b   : > { %2845 = vmatpush3.bf16.msra.mxu1 %v3224_v15  ;;  %2867 = vmatpush3.bf16.msra.mxu0 %v3225_v16 }
 0xb0c   : > { %2846 = vmatprep.subr.bf16.mxu1 %v3226_v17  ;;  %2868 = vmatprep.subr.bf16.mxu0 %v3227_v18 }
 0xb0f   : > { %2847 = vmatpush3.bf16.msra.mxu1 %v3228_v19  ;;  %2869 = vmatpush3.bf16.msra.mxu0 %v3229_v20  ;;  %v2791_v19 = vld [vmem:[%s776_s21] ss:$0 sm:$0xff] }
 0xb10   : > { %2848 = vmatprep.subr.bf16.mxu1 %v3230_v21  ;;  %2870 = vmatprep.subr.bf16.mxu0 %v3231_v22 }
 0xb13   : > { %2849 = vmatpush3.bf16.msra.mxu1 %v3232_v23  ;;  %2871 = vmatpush3.bf16.msra.mxu0 %v3233_v24 }
 0xbc9   : > { %v1939_v31 = vpop.f32.mrb[28].mxu1  ;;  %v1980_v32 = vpop.f32.mrb[16].mxu0 }
 0xbca   : > { %v1940_v33 = vadd.f32 %v1939_v31, %v1728_v0  ;;  %v1981_v34 = vadd.f32 %v1980_v32, %v1736_v28  ;;  %v1941_v35 = vpop.f32.mrb[29].mxu1  ;;  %v1982_v36 = vpop.f32.mrb[17].mxu0 }
 0xbcb   : > { %v1942_v37 = vadd.f32 %v1941_v35, %v1732_v29  ;;  %v1983_v38 = vadd.f32 %v1982_v36, %v1740_v30  ;;  %v1943_v39 = vpop.f32.mrb[30].mxu1  ;;  %v1984_v40 = vpop.f32.mrb[18].mxu0 }
 0xbcc   : > { %v2755_v41 = vmul.f32 -1.702, %v1940_v33  ;;  %v2757_v42 = vmul.f32 -1.702, %v1981_v34  ;;  %v1944_v48 = vpop.f32.mrb[31].mxu1  ;;  %v1985_v45 = vpop.f32.mrb[19].mxu0 }
 0xbcd   : > { %v2756_v47 = vmul.f32 -1.702, %v1942_v37  ;;  %v2758_v46 = vmul.f32 -1.702, %v1983_v38 }
 0xbce   : > { %v1995_v49 = vmul.f32 1.442695, %v2755_v41  ;;  %v1999_v43 = vmul.f32 1.442695, %v2757_v42 }
 0xbcf   : > { %v1997_v44 = vmul.f32 1.442695, %v2756_v47  ;;  %v2001_v50 = vmul.f32 1.442695, %v2758_v46 }
 0xbd0   : > { %3254 = vpow2.f32 %v1995_v49 }
 0xbd1   : > { %3256 = vpow2.f32 %v1999_v43 }
 0xbd2   : > { %3258 = vpow2.f32 %v1997_v44 }
 0xbd3   : > { %3260 = vpow2.f32 %v2001_v50 }
 0xbda   : > { %v3255_v51 = vpop.eup %3254 }
 0xbdb   : > { %v3257_v52 = vpop.eup %3256  ;;  %v2003_v53 = vadd.f32 1.0, %v3255_v51 }
 0xbdc   : > { %v3259_v54 = vpop.eup %3258  ;;  %v2005_v55 = vadd.f32 1.0, %v3257_v52 }
 0xbdd   : > { %v3261_v56 = vpop.eup %3260  ;;  %3262 = vrcp.f32 %v2003_v53  ;;  %v2004_v57 = vadd.f32 1.0, %v3259_v54 }
 0xbde   : > { %3264 = vrcp.f32 %v2005_v55  ;;  %v2006_v58 = vadd.f32 1.0, %v3261_v56 }
 0xbdf   : > { %3266 = vrcp.f32 %v2004_v57 }
 0xbe0   : > { %3268 = vrcp.f32 %v2006_v58 }
 0xbe7   : > { %v3263_v59 = vpop.eup %3262 }
 0xbe8   : > { %v3265_v4 = vpop.eup %3264  ;;  %v2015_v61 = vmul.f32 %v3263_v59, %v1940_v33 }
 0xbe9   : > { %v3267_v60 = vpop.eup %3266  ;;  %v2017_v63 = vmul.f32 %v3265_v4, %v1981_v34 }
 0xbea   : > { %v3269_v62 = vpop.eup %3268  ;;  %v2016_v2 = vmul.f32 %v3267_v60, %v1942_v37  ;;  %v2019_v8 = vpack.c.bf16 %v2015_v61, %v2015_v61 }
 0xbeb   : > { %v2018_v3 = vmul.f32 %v3269_v62, %v1983_v38  ;;  %v2021_v9 = vpack.c.bf16 %v2017_v63, %v2017_v63 }
 0xbec   : > { %v2020_v5 = vpack.c.bf16 %v2016_v2, %v2016_v2 }
 0xbed   : > { %v2022_v26 = vpack.c.bf16 %v2018_v3, %v2018_v3 }
 0xbee   : > { %2311 = vmatprep.mubr.bf16.mxu1 %v2020_v5 }
 0xbef   : > { %2351 = vmatprep.mubr.bf16.mxu0 %v2022_v26  ;;  %2312 = vmatmul.mubr.bf16.vlgmr.msra.gmra.mrb[32].mxu1 %v2019_v8 }
 0xbf0   : > { %2352 = vmatmul.mubr.bf16.vlgmr.msra.gmra.mrb[20].mxu0 %v2021_v9 }
 0xcc2   : > { %v2850_v10 = vpop.f32.mrb[32].mxu1 }
 0xcc3   : > { %v2872_v11 = vpop.f32.mrb[20].mxu0  ;;  %v2851_v12 = vpop.f32.mrb[33].mxu1 }
 0xcc4   : > { %v2852_v7 = vadd.f32 %v2851_v12, %v2850_v10  ;;  %v2873_v1 = vpop.f32.mrb[21].mxu0  ;;  %v2853_v13 = vpop.f32.mrb[34].mxu1 }
 0xcc5   : > { %v2874_v14 = vadd.f32 %v2873_v1, %v2872_v11  ;;  %v2875_v15 = vpop.f32.mrb[22].mxu0  ;;  %v2854_v16 = vpop.f32.mrb[35].mxu1 }
 0xcc6   : > { %v2876_v17 = vpop.f32.mrb[23].mxu0 }
 0xcc7   : > { %v2354_v18 = vadd.f32 %v2874_v14, %v2852_v7  ;;  %2372 = sbr.rel (%p2792_p5) target bundleno = 3278 (0xcce), region = 108 }
 0xcc9   : > { %v2359_v20 = vadd.f32 %v2354_v18, %v4349_v6 }
 0xccb   : > { %v2367_v21 = vadd.f32 %v2791_v19, %v2359_v20 }
 0xccd   : > { %2368 = vst [vmem:[#allocation2] sm:$0xff] %v2367_v21  ;;  %2373 = vst [vmem:[%s4189_s26] sm:$0xff] (!%p2792_p5), %v2367_v21 }
 0xcce PF: > { %s4637_s2 = sld [smem:[#allocation28_spill]]  ;;  %s4638_s12 = sld [smem:[#allocation38_spill]] }
 0xccf   : > { %s4639_s4 = sld [smem:[#allocation55_spill]]  ;;  %s2388_s3 = sshll.u32 %s4189_s26, 4  ;;  %s2389_s3 = int_to_ptr.vmem [resolvable:$true] %s2388_s3 }
 0xcd0   : > { %s2375_s21 = scalar_lea.sflag [#allocation6], %s4114_s15  ;;  %s3480_s1 = scalar_lea.vmem %s2389_s3, 128 }
 0xcd1   : > { %p3481_p0 = scmp.ne.s32.totalorder %s2389_s3, %s3480_s1  ;;  %s3635_s7 = smov [#allocation16]  }
 0xcd2   : > { %s3484_s0 = sshll.u32 %s3635_s7, 4  ;;  %s3485_s0 = int_to_ptr.vmem [resolvable:$false] %s3484_s0 }
 0xcd3   : > { %s3486_s9 = scalar_lea.vmem %s3485_s0, 256  ;;  %p3487_p11 = scmp.lt.s32.totalorder %s2389_s3, %s3485_s0 }
 0xcd4   : > { %s2794_s8 = sshll.u32 %s4637_s2, 7  ;;  %p4640_p6 = scmp.ne.s32.totalorder %s4638_s12, 0 }
 0xcd5   : > { %s4447_s20 = scalar_lea.hbm %s4639_s4, %s2794_s8  ;;  %p3488_p2 = scmp.lt.s32.totalorder %s3486_s9, %s3480_s1 }
 0xcd6   : > { %p3482_p4 = pnand %p3481_p0, %p4640_p6 }
 0xcd7   : > { %p3489_p3 = por %p3488_p2, %p3487_p11 }
 0xcd8   : > { %p3483_p8 = pneg %p3482_p4 }
 0xcda   : > { %p3490_p1 = pnand %p3489_p3, %p3483_p8 }
 0xcdc   : > { %3493 = shalt.err (!%p3490_p1)
}
 0xcdd   : > { %s3494_s15 = scalar_lea.hbm %s4447_s20, 128  ;;  %s3498_s27 = scalar_lea.hbm %s4639_s4, 256 }
 0xcde   : > { %p3495_p7 = scmp.ne.s32.totalorder %s4447_s20, %s3494_s15  ;;  %p3499_p10 = scmp.lt.u32.totalorder %s4447_s20, %s4639_s4 }
 0xcdf   : > { %p3500_p9 = scmp.lt.u32.totalorder %s3498_s27, %s3494_s15  ;;  %p3502_p0 = scmp.lt.u32.totalorder %s3494_s15, %s4447_s20 }
 0xce0   : > { %p3496_p12 = pnand %p3495_p7, %p4640_p6 }
 0xce1   : > { %p3501_p5 = por %p3500_p9, %p3499_p10 }
 0xce2   : > { %p3497_p13 = pneg %p3496_p12 }
 0xce3   : > { %p3503_p4 = por %p3502_p0, %p3501_p5 }
 0xce5   : > { %p3504_p8 = pnand %p3503_p4, %p3497_p13 }
 0xce7   : > { %3507 = shalt.err (!%p3504_p8)
}
 0xce8   : > { %2984 = dma.vmem_to_hbm [thread:$0]  (%p4640_p6), %s2389_s3, 128, %s4447_s20, %s2375_s21  }
 0xce9 PF: > { %s4641_s30 = sld [smem:[#allocation31_spill]]  ;;  %s4642_s16 = sld [smem:[#allocation24_spill]] }
 0xcea   : > { %s4643_s5 = sld [smem:[#allocation41_spill]] }
 0xcef   : > { %p3013_p11 = scmp.ge.s32.totalorder %s4641_s30, 2  ;;  %s2400_s23 = sand.u32 1, %s4642_s16  }
 0xcf0   : > { %p4644_p2 = scmp.ne.s32.totalorder %s4643_s5, 0  ;;  %s2401_s25 = scalar_lea.sflag [#allocation6], %s2400_s23 }
 0xcf2   : > { %p3009_p3 = pnand %p3013_p11, %p4644_p2 }
 0xcf4   : > { %3569 = dma.done.wait (!%p3009_p3), %s2401_s25, 128  }
 0xcf5   : > { %3571 = vsyncadd (!%p3009_p3), %s2401_s25, 4294967168  ;;  %s38_s18 = sadd.s32 1, %s4641_s30   ;;  %s4645_s25 = sld [smem:[#allocation22_spill]] }
 0xcf6   : > { %p35_p1 = scmp.ge.s32.totalorder %s38_s18, 6   ;;  %s4646_s26 = sld [smem:[#allocation23_spill]] }
 0xcf7   : > { %s4647_s27 = sld [smem:[#allocation39_spill]]  ;;  %s4648_s28 = sld [smem:[#allocation25_spill]] }
 0xcf8   : > { %s4649_s29 = sld [smem:[#allocation26_spill]]  ;;  %s4650_s30 = sld [smem:[#allocation40_spill]] }
 0xcf9   : > { %s4651_s14 = sld [smem:[#allocation29_spill]]  ;;  %s4652_s15 = sld [smem:[#allocation30_spill]] }
 0xcfa   : > { %s4653_s16 = sld [smem:[#allocation34_spill]]  ;;  %s4654_s17 = sld [smem:[#allocation35_spill]] }
 0xcfb   :  { %37 = sbr.rel (!%p35_p1) target bundleno = 30 (0x1e), region = 215 }
 0xd02   :  { %2406 = vsyncpa [#allocation5], 1 }
 0xd03   :  { %2408 = vsyncpa [#allocation5 + $0x1], 1 }
 0xd04   :  { %2409 = vsyncpa [#allocation8], 1 }
 0xd05   :  { %2411 = vsyncpa [#allocation8 + $0x1], 1 }
 0xd06   :  { %2412 = vsyncpa [#allocation11], 1 }
 0xd07   :  { %2414 = vsyncpa [#allocation11 + $0x1], 1 }
 0xd08   :  { %2415 = vsyncpa [#allocation14], 1 }
 0xd09   :  { %2417 = vsyncpa [#allocation14 + $0x1], 1 }
 0xd0a   :  { %2418 = vsyncpa [#allocation6], 1 }
 0xd0b   :  { %2420 = vsyncpa [#allocation6 + $0x1], 1 }

</bundles_post_ra>
